<compile_context>
chip_gen: v5e
topology: v5e:2x2
jax: 0.10.0
libtpu: 0.0.40
codegen_flags: <defaults>
</compile_context>

<pallas_src>
import functools

import jax
import jax.numpy as jnp
from jax.experimental import pallas as pl
from jax.experimental.pallas import tpu as pltpu  # noqa: F401 (kept for TPU params if needed)


# ---------------------------- Pallas kernels ----------------------------

def _bn(y, g, b, eps):
    """Batch-statistics BatchNorm over rows (f32), per-channel columns."""
    m = y.shape[0]
    mean = jnp.sum(y, axis=0, keepdims=True) / m
    yc = y - mean
    var = jnp.sum(yc * yc, axis=0, keepdims=True) / m
    return yc * jax.lax.rsqrt(var + eps) * g + b


def _conv_bn_relu_kernel(x_ref, w_ref, g_ref, b_ref, o_ref, *, eps):
    """(M, K)bf16 @ (K, Cout)bf16 -> f32, fused BN + ReLU epilogue."""
    y = jnp.dot(x_ref[...], w_ref[...], preferred_element_type=jnp.float32)
    o_ref[...] = jnp.maximum(_bn(y, g_ref[...], b_ref[...], eps), 0.0)


def _conv_bn_add_relu_kernel(x_ref, w_ref, g_ref, b_ref, sc_ref, o_ref, *, eps):
    """conv2 + BN2 + identity-shortcut add + ReLU, all in one kernel."""
    y = jnp.dot(x_ref[...], w_ref[...], preferred_element_type=jnp.float32)
    o_ref[...] = jnp.maximum(_bn(y, g_ref[...], b_ref[...], eps) + sc_ref[...], 0.0)


def _conv_bn_dsc_add_relu_kernel(x_ref, w_ref, g_ref, b_ref,
                                 xs_ref, ws_ref, gs_ref, bs_ref, o_ref, *, eps):
    """conv2 + BN2 and the downsample 1x1-conv + BN shortcut, add + ReLU."""
    main = _bn(jnp.dot(x_ref[...], w_ref[...], preferred_element_type=jnp.float32),
               g_ref[...], b_ref[...], eps)
    sc = _bn(jnp.dot(xs_ref[...], ws_ref[...], preferred_element_type=jnp.float32),
             gs_ref[...], bs_ref[...], eps)
    o_ref[...] = jnp.maximum(main + sc, 0.0)


def _head_kernel(x_ref, w_ref, b_ref, o_ref):
    """Global average pool over the spatial axis, then Linear."""
    x = x_ref[...]                                  # (N, HW, C) f32
    pooled = jnp.sum(x, axis=1) / x.shape[1]        # (N, C)
    o_ref[...] = jnp.dot(pooled, w_ref[...],
                         preferred_element_type=jnp.float32) + b_ref[...]


# ---------------------------- op wrappers ----------------------------

def _im2col(x, kh, kw, stride, padding):
    """x: (N,H,W,Cin) NHWC -> ((N*Ho*Wo, kh*kw*Cin), Ho, Wo)."""
    N, H, W, Cin = x.shape
    Ho = (H + 2 * padding - kh) // stride + 1
    Wo = (W + 2 * padding - kw) // stride + 1
    xp = jnp.pad(x, ((0, 0), (padding, padding), (padding, padding), (0, 0)))
    cols = [xp[:, i:i + stride * Ho:stride, j:j + stride * Wo:stride, :]
            for i in range(kh) for j in range(kw)]
    # Concatenate taps along the channel axis so K = kh*kw*Cin matches
    # w.reshape(kh*kw*Cin, Cout) ordering.
    slab = jnp.concatenate(cols, axis=-1).reshape(N * Ho * Wo, kh * kw * Cin)
    return slab, Ho, Wo


def conv_bn_relu(x, w, gamma, beta, *, stride, padding, eps=1e-5):
    N, H, W, Cin = x.shape
    kh, kw, _, Cout = w.shape
    slab, Ho, Wo = _im2col(x, kh, kw, stride, padding)
    M = N * Ho * Wo
    out = pl.pallas_call(
        functools.partial(_conv_bn_relu_kernel, eps=eps),
        out_shape=jax.ShapeDtypeStruct((M, Cout), jnp.float32),
    )(slab.astype(jnp.bfloat16),
      w.reshape(kh * kw * Cin, Cout).astype(jnp.bfloat16),
      gamma.reshape(1, Cout), beta.reshape(1, Cout))
    return out.reshape(N, Ho, Wo, Cout)


def conv_bn_add_relu(x, w, gamma, beta, shortcut, *, eps=1e-5):
    """Second conv of a block with identity shortcut (stride 1, pad 1)."""
    N, H, W, Cin = x.shape
    kh, kw, _, Cout = w.shape
    slab, Ho, Wo = _im2col(x, kh, kw, 1, 1)
    M = N * Ho * Wo
    out = pl.pallas_call(
        functools.partial(_conv_bn_add_relu_kernel, eps=eps),
        out_shape=jax.ShapeDtypeStruct((M, Cout), jnp.float32),
    )(slab.astype(jnp.bfloat16),
      w.reshape(kh * kw * Cin, Cout).astype(jnp.bfloat16),
      gamma.reshape(1, Cout), beta.reshape(1, Cout),
      shortcut.reshape(M, Cout))
    return out.reshape(N, Ho, Wo, Cout)


def conv_bn_dsc_add_relu(x, w, gamma, beta, x_in, sw, sg, sb, *, stride, eps=1e-5):
    """Second conv + BN plus downsample (1x1 conv, stride s) + BN shortcut."""
    N, H, W, Cin = x.shape          # x = conv1 output of this block
    kh, kw, _, Cout = w.shape
    slab, Ho, Wo = _im2col(x, kh, kw, 1, 1)
    M = N * Ho * Wo
    Cin0 = x_in.shape[-1]
    # im2col of a 1x1 stride-s conv is just spatial subsampling.
    xs = x_in[:, ::stride, ::stride, :].reshape(M, Cin0)
    out = pl.pallas_call(
        functools.partial(_conv_bn_dsc_add_relu_kernel, eps=eps),
        out_shape=jax.ShapeDtypeStruct((M, Cout), jnp.float32),
    )(slab.astype(jnp.bfloat16),
      w.reshape(kh * kw * Cin, Cout).astype(jnp.bfloat16),
      gamma.reshape(1, Cout), beta.reshape(1, Cout),
      xs.astype(jnp.bfloat16),
      sw.reshape(Cin0, Cout).astype(jnp.bfloat16),
      sg.reshape(1, Cout), sb.reshape(1, Cout))
    return out.reshape(N, Ho, Wo, Cout)


def head(x, w, b):
    N, H, W, C = x.shape
    num_classes = w.shape[1]
    return pl.pallas_call(
        _head_kernel,
        out_shape=jax.ShapeDtypeStruct((N, num_classes), jnp.float32),
    )(x.reshape(N, H * W, C), w, b.reshape(1, num_classes))


# ---------------------------- model ----------------------------

def basic_block_fwd(x, p):
    out1 = conv_bn_relu(x, p["conv1_w"], p["bn1_g"], p["bn1_b"],
                        stride=p["stride"], padding=1)
    if "sc_w" in p:
        return conv_bn_dsc_add_relu(out1, p["conv2_w"], p["bn2_g"], p["bn2_b"],
                                    x, p["sc_w"], p["sc_g"], p["sc_b"],
                                    stride=p["stride"])
    return conv_bn_add_relu(out1, p["conv2_w"], p["bn2_g"], p["bn2_b"], x)


def resnet_forward(x_nchw, params):
    x = jnp.transpose(x_nchw, (0, 2, 3, 1))        # NCHW -> NHWC
    out = conv_bn_relu(x, params["conv1_w"], params["bn1_g"], params["bn1_b"],
                       stride=1, padding=1)
    for blk in params["blocks"]:
        out = basic_block_fwd(out, blk)
    # F.avg_pool2d(out, out.size(3)) + view + linear, fused in one kernel.
    return head(out, params["fc_w"], params["fc_b"])


def init_params(key, num_blocks=(1, 1, 1), num_classes=10):
    def kaiming(k, shape, fan_in):
        return jax.random.normal(k, shape, jnp.float32) * jnp.sqrt(2.0 / fan_in)

    keys = iter(jax.random.split(key, 64))
    params = {
        "conv1_w": kaiming(next(keys), (3, 3, 3, 16), 3 * 3 * 3),
        "bn1_g": jnp.ones((16,), jnp.float32),
        "bn1_b": jnp.zeros((16,), jnp.float32),
        "blocks": [],
    }
    in_planes = 16
    for planes, nb, stride0 in zip((16, 32, 64), num_blocks, (1, 2, 2)):
        for i in range(nb):
            stride = stride0 if i == 0 else 1
            blk = {
                "stride": stride,
                "conv1_w": kaiming(next(keys), (3, 3, in_planes, planes),
                                   9 * in_planes),
                "bn1_g": jnp.ones((planes,), jnp.float32),
                "bn1_b": jnp.zeros((planes,), jnp.float32),
                "conv2_w": kaiming(next(keys), (3, 3, planes, planes),
                                   9 * planes),
                "bn2_g": jnp.ones((planes,), jnp.float32),
                "bn2_b": jnp.zeros((planes,), jnp.float32),
            }
            if stride != 1 or in_planes != planes:
                blk["sc_w"] = kaiming(next(keys), (1, 1, in_planes, planes),
                                      in_planes)
                blk["sc_g"] = jnp.ones((planes,), jnp.float32)
                blk["sc_b"] = jnp.zeros((planes,), jnp.float32)
            params["blocks"].append(blk)
            in_planes = planes
    params["fc_w"] = kaiming(next(keys), (64, num_classes), 64)
    params["fc_b"] = jnp.zeros((num_classes,), jnp.float32)
    return params


if __name__ == "__main__":
    key = jax.random.PRNGKey(0)
    pkey, xkey = jax.random.split(key)
    params = init_params(pkey)
    x = jax.random.normal(xkey, (2, 3, 16, 16), jnp.float32)   # NCHW, like PyTorch
    logits = resnet_forward(x, params)
    jax.block_until_ready(logits)
    assert logits.shape == (2, 10) and logits.dtype == jnp.float32
    print("KERNEL_OK")
</pallas_src>

<mosaic_0001>
module attributes {stable_mosaic.version = 11 : i64} {
  func.func @_conv_bn_relu_kernel(%arg0: memref<512x27xbf16, #tpu.memory_space<vmem>>, %arg1: memref<27x16xbf16, #tpu.memory_space<vmem>>, %arg2: memref<1x16xf32, #tpu.memory_space<vmem>>, %arg3: memref<1x16xf32, #tpu.memory_space<vmem>>, %arg4: memref<512x16xf32, #tpu.memory_space<vmem>>) attributes {dimension_semantics = [], scalar_prefetch = 0 : i64, scratch_operands = 0 : i64, tpu.core_type = #tpu.core_type<tc>} {
    %c0 = arith.constant 0 : index
    %c0_0 = arith.constant 0 : index
    %0 = vector.load %arg0[%c0, %c0_0] : memref<512x27xbf16, #tpu.memory_space<vmem>>, vector<512x27xbf16>
    %c0_1 = arith.constant 0 : index
    %c0_2 = arith.constant 0 : index
    %1 = vector.load %arg1[%c0_1, %c0_2] : memref<27x16xbf16, #tpu.memory_space<vmem>>, vector<27x16xbf16>
    %cst = arith.constant dense<0.000000e+00> : vector<512x16xf32>
    %2 = tpu.matmul %0, %1, %cst {dimension_numbers = #tpu.dot_dimension_numbers<[1], [0], [0], [1], [0, 0, 1, 1], [], []>} : vector<512x27xbf16>, vector<27x16xbf16>, vector<512x16xf32> -> vector<512x16xf32>
    %c0_3 = arith.constant 0 : index
    %c0_4 = arith.constant 0 : index
    %3 = vector.load %arg2[%c0_3, %c0_4] : memref<1x16xf32, #tpu.memory_space<vmem>>, vector<1x16xf32>
    %c0_5 = arith.constant 0 : index
    %c0_6 = arith.constant 0 : index
    %4 = vector.load %arg3[%c0_5, %c0_6] : memref<1x16xf32, #tpu.memory_space<vmem>>, vector<1x16xf32>
    %cst_7 = arith.constant dense<0.000000e+00> : vector<16xf32>
    %5 = vector.multi_reduction <add>, %2, %cst_7 [0] : vector<512x16xf32> to vector<16xf32>
    %6 = vector.shape_cast %5 : vector<16xf32> to vector<1x16xf32>
    %cst_8 = arith.constant 5.120000e+02 : f32
    %7 = vector.broadcast %cst_8 : f32 to vector<1x16xf32>
    %8 = arith.divf %6, %7 : vector<1x16xf32>
    %9 = vector.broadcast %8 : vector<1x16xf32> to vector<512x16xf32>
    %10 = arith.subf %2, %9 : vector<512x16xf32>
    %11 = arith.mulf %10, %10 : vector<512x16xf32>
    %cst_9 = arith.constant dense<0.000000e+00> : vector<16xf32>
    %12 = vector.multi_reduction <add>, %11, %cst_9 [0] : vector<512x16xf32> to vector<16xf32>
    %13 = vector.shape_cast %12 : vector<16xf32> to vector<1x16xf32>
    %cst_10 = arith.constant 5.120000e+02 : f32
    %14 = vector.broadcast %cst_10 : f32 to vector<1x16xf32>
    %15 = arith.divf %13, %14 : vector<1x16xf32>
    %cst_11 = arith.constant 9.99999974E-6 : f32
    %16 = vector.broadcast %cst_11 : f32 to vector<1x16xf32>
    %17 = arith.addf %15, %16 : vector<1x16xf32>
    %18 = math.rsqrt %17 : vector<1x16xf32>
    %19 = vector.broadcast %18 : vector<1x16xf32> to vector<512x16xf32>
    %20 = arith.mulf %10, %19 : vector<512x16xf32>
    %21 = vector.broadcast %3 : vector<1x16xf32> to vector<512x16xf32>
    %22 = arith.mulf %20, %21 : vector<512x16xf32>
    %23 = vector.broadcast %4 : vector<1x16xf32> to vector<512x16xf32>
    %24 = arith.addf %22, %23 : vector<512x16xf32>
    %cst_12 = arith.constant 0.000000e+00 : f32
    %25 = vector.broadcast %cst_12 : f32 to vector<512x16xf32>
    %26 = arith.maximumf %24, %25 : vector<512x16xf32>
    %c0_13 = arith.constant 0 : index
    %c0_14 = arith.constant 0 : index
    %27 = vector.load %arg4[%c0_13, %c0_14] : memref<512x16xf32, #tpu.memory_space<vmem>>, vector<512x16xf32>
    tpu.vector_store %arg4[%c0_13, %c0_14], %26 {strides = array<i32>} : memref<512x16xf32, #tpu.memory_space<vmem>>, vector<512x16xf32>,
    return
  }
}

</mosaic_0001>

<bundles_post_ra>
// kernel: tpu_custom_call.1
= control target key start
LH: loop header
LB: loop body
LE: loop exit
PB: predicated region body
PF: predicated region fallthrough
CT: control target
= control target key end

     0   :  { %vm354_vm0 = vcmask 1044480   ;;  %vm355_vm1 = vcmask 1045504   ;;  %v1493_v2 = vmov 65535   ;;  %vm257_vm2 = vcmask 220160   ;;  %s2889_s1 = inlined_call_operand.vmem [shape: bf16[27,16], index: 1, kind: input, shape index: {}]   ;;  %s2890_s0 = inlined_call_operand.vmem [shape: bf16[512,27], index: 0, kind: input, shape index: {}]   ;;  %s2891_s2 = inlined_call_operand.vmem [shape: f32[1,16], index: 2, kind: input, shape index: {}]   ;;  %s2892_s3 = inlined_call_operand.vmem [shape: f32[1,16], index: 3, kind: input, shape index: {}]   ;;  %s2893_s4 = inlined_call_operand.vmem [shape: f32[512,16], index: 4, kind: output, shape index: {}]  }
   0x1   :  { %v1411_v0 = vld [vmem:[%s2889_s1 + $0x8] sm:$0xf]  ;;  %v1478_v1 = vld [vmem:[%s2889_s1 + $0x8] sm:$0x30]  ;;  %v356_v3 = vsel %vm354_vm0, 4294967295, %v1493_v2  ;;  %v1477_v7 = vld [vmem:[%s2889_s1] sm:$0xff] }
   0x2   :  { %v1412_v4 = vor.u32 %v1478_v1, %v1411_v0  ;;  %v357_v5 = vsel %vm355_vm1, %v356_v3, 0  ;;  %v1445_v8 = vld [vmem:[%s2890_s0] sm:$0xff]  ;;  %v1446_v10 = vld [vmem:[%s2890_s0 + $0x8] sm:$0xff]  ;;  %v1447_v13 = vld [vmem:[%s2890_s0 + $0x10] sm:$0xff]  ;;  %vm532_vm3 = vcmask 130048  }
   0x3   :  { %v1453_v9 = vld [vmem:[%s2890_s0 + $0x40] sm:$0xff]  ;;  %v1454_v11 = vld [vmem:[%s2890_s0 + $0x48] sm:$0xff]  ;;  %v1455_v14 = vld [vmem:[%s2890_s0 + $0x50] sm:$0xff] }
   0x4   :  { %v359_v6 = vand.u32 %v1412_v4, %v357_v5  ;;  %v1461_v12 = vld [vmem:[%s2890_s0 + $0x80] sm:$0xff]  ;;  %v1462_v15 = vld [vmem:[%s2890_s0 + $0x88] sm:$0xff]  ;;  %v1448_v16 = vld [vmem:[%s2890_s0 + $0x18] sm:$0xff] }
   0x5   :  { %v1456_v17 = vld [vmem:[%s2890_s0 + $0x58] sm:$0xff]  ;;  %v1463_v18 = vld [vmem:[%s2890_s0 + $0x90] sm:$0xff]  ;;  %v1469_v19 = vld [vmem:[%s2890_s0 + $0xc0] sm:$0xff] }
   0x6   :  { %367 = vmatpush.bf16.msra.mxu0 %v359_v6  ;;  %1479 = vmatpush.bf16.msra.mxu1 %v359_v6  ;;  %v1449_v20 = vld [vmem:[%s2890_s0 + $0x20] sm:$0xff]  ;;  %v1464_v22 = vld [vmem:[%s2890_s0 + $0x98] sm:$0xff]  ;;  %v1470_v23 = vld [vmem:[%s2890_s0 + $0xc8] sm:$0xff] }
   0x7   :  { %1480 = vmatpush.bf16.msra.mxu2 %v359_v6  ;;  %1481 = vmatpush.bf16.msra.mxu3 %v359_v6  ;;  %v1457_v21 = vld [vmem:[%s2890_s0 + $0x60] sm:$0xff]  ;;  %v1450_v24 = vld [vmem:[%s2890_s0 + $0x28] sm:$0xff]  ;;  %v1471_v27 = vld [vmem:[%s2890_s0 + $0xd0] sm:$0xff] }
   0x8   :  { %v1458_v25 = vld [vmem:[%s2890_s0 + $0x68] sm:$0xff]  ;;  %v1465_v26 = vld [vmem:[%s2890_s0 + $0xa0] sm:$0xff]  ;;  %v1451_v28 = vld [vmem:[%s2890_s0 + $0x30] sm:$0xff] }
   0x9   :  { %v1459_v29 = vld [vmem:[%s2890_s0 + $0x70] sm:$0xff]  ;;  %v1466_v30 = vld [vmem:[%s2890_s0 + $0xa8] sm:$0xff]  ;;  %v1472_v31 = vld [vmem:[%s2890_s0 + $0xd8] sm:$0xff] }
   0xa   :  { %368 = vmatpush.bf16.msra.mxu0 %v1477_v7  ;;  %1482 = vmatpush.bf16.msra.mxu1 %v1477_v7  ;;  %v1452_v32 = vld [vmem:[%s2890_s0 + $0x38] sm:$0xff]  ;;  %v1467_v34 = vld [vmem:[%s2890_s0 + $0xb0] sm:$0xff]  ;;  %v1473_v35 = vld [vmem:[%s2890_s0 + $0xe0] sm:$0xff] }
   0xb   :  { %1483 = vmatpush.bf16.msra.mxu2 %v1477_v7  ;;  %1484 = vmatpush.bf16.msra.mxu3 %v1477_v7  ;;  %v1460_v33 = vld [vmem:[%s2890_s0 + $0x78] sm:$0xff]  ;;  %v1474_v39 = vld [vmem:[%s2890_s0 + $0xe8] sm:$0xff]  ;;  %v1475_v43 = vld [vmem:[%s2890_s0 + $0xf0] sm:$0xff] }
   0xc   :  { %v1468_v38 = vld [vmem:[%s2890_s0 + $0xb8] sm:$0xff] }
   0xd   :  { %1413 = vmatmul.msk.bf16.vlgmr.msra.gmra.mxu0 %vm257_vm2, %v1445_v8  ;;  %1421 = vmatmul.msk.bf16.vlgmr.msra.gmra.mxu1 %vm257_vm2, %v1453_v9  ;;  %v1476_v49 = vld [vmem:[%s2890_s0 + $0xf8] sm:$0xff] }
   0xe   :  { %1429 = vmatmul.msk.bf16.vlgmr.msra.gmra.mxu2 %vm257_vm2, %v1461_v12  ;;  %1437 = vmatmul.msk.bf16.vlgmr.msra.gmra.mxu3 %vm257_vm2, %v1469_v19 }
  0x1d   :  { %1414 = vmatmul.msk.bf16.gmra.mxu0 %vm257_vm2, %v1446_v10  ;;  %1422 = vmatmul.msk.bf16.gmra.mxu1 %vm257_vm2, %v1454_v11 }
  0x1e   :  { %1430 = vmatmul.msk.bf16.gmra.mxu2 %vm257_vm2, %v1462_v15  ;;  %1438 = vmatmul.msk.bf16.gmra.mxu3 %vm257_vm2, %v1470_v23 }
  0x2d   :  { %1415 = vmatmul.msk.bf16.gmra.mxu0 %vm257_vm2, %v1447_v13  ;;  %1423 = vmatmul.msk.bf16.gmra.mxu1 %vm257_vm2, %v1455_v14 }
  0x2e   :  { %1431 = vmatmul.msk.bf16.gmra.mxu2 %vm257_vm2, %v1463_v18  ;;  %1439 = vmatmul.msk.bf16.gmra.mxu3 %vm257_vm2, %v1471_v27 }
  0x3d   :  { %1416 = vmatmul.msk.bf16.gmra.mxu0 %vm257_vm2, %v1448_v16  ;;  %1424 = vmatmul.msk.bf16.gmra.mxu1 %vm257_vm2, %v1456_v17 }
  0x3e   :  { %1432 = vmatmul.msk.bf16.gmra.mxu2 %vm257_vm2, %v1464_v22  ;;  %1440 = vmatmul.msk.bf16.gmra.mxu3 %vm257_vm2, %v1472_v31 }
  0x4d   :  { %1417 = vmatmul.msk.bf16.gmra.mxu0 %vm257_vm2, %v1449_v20  ;;  %1425 = vmatmul.msk.bf16.gmra.mxu1 %vm257_vm2, %v1457_v21 }
  0x4e   :  { %1433 = vmatmul.msk.bf16.gmra.mxu2 %vm257_vm2, %v1465_v26  ;;  %1441 = vmatmul.msk.bf16.gmra.mxu3 %vm257_vm2, %v1473_v35 }
  0x5d   :  { %1418 = vmatmul.msk.bf16.gmra.mxu0 %vm257_vm2, %v1450_v24  ;;  %1426 = vmatmul.msk.bf16.gmra.mxu1 %vm257_vm2, %v1458_v25 }
  0x5e   :  { %1434 = vmatmul.msk.bf16.gmra.mxu2 %vm257_vm2, %v1466_v30  ;;  %1442 = vmatmul.msk.bf16.gmra.mxu3 %vm257_vm2, %v1474_v39 }
  0x6d   :  { %1419 = vmatmul.msk.bf16.gmra.mxu0 %vm257_vm2, %v1451_v28  ;;  %1427 = vmatmul.msk.bf16.gmra.mxu1 %vm257_vm2, %v1459_v29 }
  0x6e   :  { %1435 = vmatmul.msk.bf16.gmra.mxu2 %vm257_vm2, %v1467_v34  ;;  %1443 = vmatmul.msk.bf16.gmra.mxu3 %vm257_vm2, %v1475_v43 }
  0x7d   :  { %1420 = vmatmul.msk.bf16.gmra.mxu0 %vm257_vm2, %v1452_v32  ;;  %1428 = vmatmul.msk.bf16.gmra.mxu1 %vm257_vm2, %v1460_v33 }
  0x7e   :  { %1436 = vmatmul.msk.bf16.gmra.mxu2 %vm257_vm2, %v1468_v38  ;;  %1444 = vmatmul.msk.bf16.gmra.mxu3 %vm257_vm2, %v1476_v49 }
  0x8a   :  { %v1641_v36 = vpop.f32.mrf.mxu0  ;;  %v1643_v37 = vpop.f32.mrf.mxu1 }
  0x8b   :  { %v533_v9 = vsel %vm532_vm3, %v1641_v36, 0.0 }
  0x91   :  { %v1669_v47 = vpop.f32.mrf.mxu2  ;;  %v1703_v63 = vpop.f32.mrf.mxu3 }
  0x92   :  { %v1653_v40 = vpop.f32.mrf.mxu0  ;;  %v1655_v41 = vpop.f32.mrf.mxu1 }
  0x93   :  { %v534_v6 = vsel %vm532_vm3, %v1653_v40, 0.0 }
  0x94   :  { %v535_v11 = vadd.f32 %v534_v6, %v533_v9 }
  0x99   :  { %v1681_v52 = vpop.f32.mrf.mxu2  ;;  %v1711_v3 = vpop.f32.mrf.mxu3 }
  0x9a   :  { %v1657_v42 = vpop.f32.mrf.mxu0  ;;  %v1662_v44 = vpop.f32.mrf.mxu1 }
  0x9b   :  { %v536_v10 = vsel %vm532_vm3, %v1657_v42, 0.0 }
  0x9c   :  { %v537_v13 = vadd.f32 %v536_v10, %v535_v11 }
  0xa1   :  { %v1687_v55 = vpop.f32.mrf.mxu2  ;;  %v1721_v8 = vpop.f32.mrf.mxu3 }
  0xa2   :  { %v1665_v45 = vpop.f32.mrf.mxu0  ;;  %v1667_v46 = vpop.f32.mrf.mxu1  ;;  %2934 = vst [vmem:[#allocation4_spill] sm:$0xff] %v1721_v8 }
  0xa3   :  { %v538_v12 = vsel %vm532_vm3, %v1665_v45, 0.0 }
  0xa4   :  { %v539_v16 = vadd.f32 %v538_v12, %v537_v13 }
  0xa9   :  { %v1693_v58 = vpop.f32.mrf.mxu2  ;;  %v1741_v23 = vpop.f32.mrf.mxu3 }
  0xaa   :  { %v1671_v48 = vpop.f32.mrf.mxu0  ;;  %v1679_v51 = vpop.f32.mrf.mxu1  ;;  %2932 = vst [vmem:[#allocation2_spill] sm:$0xff] %v1693_v58 }
  0xab   :  { %v540_v15 = vsel %vm532_vm3, %v1671_v48, 0.0 }
  0xac   :  { %v541_v18 = vadd.f32 %v540_v15, %v539_v16 }
  0xb1   :  { %v1699_v61 = vpop.f32.mrf.mxu2  ;;  %v1761_v43 = vpop.f32.mrf.mxu3 }
  0xb2   :  { %v1677_v50 = vpop.f32.mrf.mxu0  ;;  %v1685_v54 = vpop.f32.mrf.mxu1  ;;  %2933 = vst [vmem:[#allocation3_spill] sm:$0xff] %v1699_v61 }
  0xb3   :  { %v542_v17 = vsel %vm532_vm3, %v1677_v50, 0.0 }
  0xb4   :  { %v543_v22 = vadd.f32 %v542_v17, %v541_v18 }
  0xb9   :  { %v1709_v2 = vpop.f32.mrf.mxu2 }
  0xba   :  { %v1683_v53 = vpop.f32.mrf.mxu0  ;;  %v1691_v57 = vpop.f32.mrf.mxu1 }
  0xbb   :  { %v544_v20 = vsel %vm532_vm3, %v1683_v53, 0.0 }
  0xbc   :  { %v545_v25 = vadd.f32 %v544_v20, %v543_v22  ;;  %v1777_v22 = vpop.f32.mrf.mxu3 }
  0xc1   :  { %v1719_v7 = vpop.f32.mrf.mxu2 }
  0xc2   :  { %v1689_v56 = vpop.f32.mrf.mxu0  ;;  %v1697_v60 = vpop.f32.mrf.mxu1 }
  0xc3   :  { %v546_v24 = vsel %vm532_vm3, %v1689_v56, 0.0 }
  0xc4   :  { %v547_v28 = vadd.f32 %v546_v24, %v545_v25  ;;  %v564_v24 = vsel %vm532_vm3, %v1643_v37, 0.0 }
  0xc9   :  { %v1739_v21 = vpop.f32.mrf.mxu2 }
  0xca   :  { %v1695_v59 = vpop.f32.mrf.mxu0  ;;  %v1707_v1 = vpop.f32.mrf.mxu1 }
  0xcb   :  { %v548_v27 = vsel %vm532_vm3, %v1695_v59, 0.0 }
  0xcc   :  { %v549_v30 = vadd.f32 %v548_v27, %v547_v28  ;;  %v566_v27 = vsel %vm532_vm3, %v1655_v41, 0.0 }
  0xd1   :  { %v1757_v35 = vpop.f32.mrf.mxu2 }
  0xd2   :  { %v1701_v62 = vpop.f32.mrf.mxu0  ;;  %v1715_v5 = vpop.f32.mrf.mxu1  ;;  %2935 = vst [vmem:[#allocation5_spill] sm:$0xff] %v1757_v35 }
  0xd3   :  { %v550_v29 = vsel %vm532_vm3, %v1701_v62, 0.0 }
  0xd4   :  { %v551_v32 = vadd.f32 %v550_v29, %v549_v30  ;;  %v568_v29 = vsel %vm532_vm3, %v1662_v44, 0.0 }
  0xd9   :  { %v1775_v20 = vpop.f32.mrf.mxu2 }
  0xda   :  { %v1705_v0 = vpop.f32.mrf.mxu0  ;;  %v1735_v19 = vpop.f32.mrf.mxu1  ;;  %2936 = vst [vmem:[#allocation6_spill] sm:$0xff] %v1775_v20 }
  0xdb   :  { %v552_v31 = vsel %vm532_vm3, %v1705_v0, 0.0 }
  0xdc   :  { %v553_v38 = vadd.f32 %v552_v31, %v551_v32  ;;  %v570_v31 = vsel %vm532_vm3, %v1667_v46, 0.0 }
  0xe2   :  { %v1713_v4 = vpop.f32.mrf.mxu0  ;;  %v1753_v33 = vpop.f32.mrf.mxu1 }
  0xe3   :  { %v554_v34 = vsel %vm532_vm3, %v1713_v4, 0.0 }
  0xe4   :  { %v555_v6 = vadd.f32 %v554_v34, %v553_v38  ;;  %v572_v38 = vsel %vm532_vm3, %v1679_v51, 0.0 }
  0xea   :  { %v1729_v14 = vpop.f32.mrf.mxu0  ;;  %v1771_v16 = vpop.f32.mrf.mxu1 }
  0xeb   :  { %v556_v49 = vsel %vm532_vm3, %v1729_v14, 0.0 }
  0xec   :  { %v557_v10 = vadd.f32 %v556_v49, %v555_v6  ;;  %v1791_v6 = vpop.f32.mrf.mxu2 }
  0xf2   :  { %v1745_v26 = vpop.f32.mrf.mxu0  ;;  %v1787_v34 = vpop.f32.mrf.mxu1 }
  0xf3   :  { %v558_v9 = vsel %vm532_vm3, %v1745_v26, 0.0  ;;  %2937 = vst [vmem:[#allocation7_spill] sm:$0xff] %v1787_v34 }
  0xf4   :  { %v559_v12 = vadd.f32 %v558_v9, %v557_v10  ;;  %v1793_v9 = vpop.f32.mrf.mxu3  ;;  %v574_v10 = vsel %vm532_vm3, %v1685_v54, 0.0 }
  0xfa   :  { %v1759_v39 = vpop.f32.mrf.mxu0 }
  0xfb   :  { %v560_v11 = vsel %vm532_vm3, %v1759_v39, 0.0 }
  0xfc   :  { %v561_v13 = vadd.f32 %v560_v11, %v559_v12  ;;  %v576_v12 = vsel %vm532_vm3, %v1691_v57, 0.0 }
 0x102   :  { %v1769_v15 = vpop.f32.mrf.mxu0 }
 0x103   :  { %v562_v17 = vsel %vm532_vm3, %v1769_v15, 0.0 }
 0x104   :  { %v563_v18 = vadd.f32 %v562_v17, %v561_v13  ;;  %v578_v17 = vsel %vm532_vm3, %v1697_v60, 0.0 }
 0x106   :  { %v565_v25 = vadd.f32 %v564_v24, %v563_v18  ;;  %v580_v24 = vsel %vm532_vm3, %v1707_v1, 0.0 }
 0x108   :  { %v567_v28 = vadd.f32 %v566_v27, %v565_v25  ;;  %v1803_v27 = vpop.f32.mrf.mxu1 }
 0x109   :  { %2938 = vst [vmem:[#allocation8_spill] sm:$0xff] %v1803_v27 }
 0x10a   :  { %v569_v30 = vadd.f32 %v568_v29, %v567_v28  ;;  %v582_v28 = vsel %vm532_vm3, %v1715_v5, 0.0 }
 0x10c   :  { %v571_v32 = vadd.f32 %v570_v31, %v569_v30  ;;  %v1807_v30 = vpop.f32.mrf.mxu2  ;;  %v1809_v31 = vpop.f32.mrf.mxu3 }
 0x10d   :  { %2939 = vst [vmem:[#allocation9_spill] sm:$0xff] %v1809_v31 }
 0x10e   :  { %v573_v49 = vadd.f32 %v572_v38, %v571_v32  ;;  %v584_v32 = vsel %vm532_vm3, %v1735_v19, 0.0 }
 0x110   :  { %v575_v11 = vadd.f32 %v574_v10, %v573_v49  ;;  %v586_v49 = vsel %vm532_vm3, %v1753_v33, 0.0 }
 0x112   :  { %v577_v13 = vadd.f32 %v576_v12, %v575_v11  ;;  %v588_v11 = vsel %vm532_vm3, %v1771_v16, 0.0 }
 0x114   :  { %v579_v18 = vadd.f32 %v578_v17, %v577_v13  ;;  %v590_v13 = vsel %vm532_vm3, %v1787_v34, 0.0 }
 0x116   :  { %v581_v25 = vadd.f32 %v580_v24, %v579_v18  ;;  %v1819_v18 = vpop.f32.mrf.mxu1  ;;  %v592_v24 = vsel %vm532_vm3, %v1803_v27, 0.0 }
 0x117   :  { %2940 = vst [vmem:[#allocation10_spill] sm:$0xff] %v1819_v18 }
 0x118   :  { %v583_v29 = vadd.f32 %v582_v28, %v581_v25  ;;  %v1823_v28 = vpop.f32.mrf.mxu2 }
 0x11a   :  { %v585_v38 = vadd.f32 %v584_v32, %v583_v29  ;;  %v1825_v29 = vpop.f32.mrf.mxu3  ;;  %v594_v32 = vsel %vm532_vm3, %v1819_v18, 0.0 }
 0x11b   :  { %2941 = vst [vmem:[#allocation11_spill] sm:$0xff] %v1825_v29 }
 0x11c   :  { %v587_v10 = vadd.f32 %v586_v49, %v585_v38  ;;  %v596_v49 = vsel %vm532_vm3, %v1669_v47, 0.0 }
 0x11e   :  { %v589_v12 = vadd.f32 %v588_v11, %v587_v10  ;;  %v598_v11 = vsel %vm532_vm3, %v1681_v52, 0.0 }
 0x120   :  { %v591_v17 = vadd.f32 %v590_v13, %v589_v12  ;;  %v600_v13 = vsel %vm532_vm3, %v1687_v55, 0.0  ;;  %v1837_v34 = vpop.f32.mrf.mxu2 }
 0x121   :  { %2942 = vst [vmem:[#allocation12_spill] sm:$0xff] %v1837_v34 }
 0x122   :  { %v593_v25 = vadd.f32 %v592_v24, %v591_v17  ;;  %v602_v24 = vsel %vm532_vm3, %v1693_v58, 0.0  ;;  %v1839_v18 = vpop.f32.mrf.mxu3 }
 0x123   :  { %2943 = vst [vmem:[#allocation13_spill] sm:$0xff] %v1839_v18 }
 0x124   :  { %v595_v38 = vadd.f32 %v594_v32, %v593_v25  ;;  %v604_v25 = vsel %vm532_vm3, %v1699_v61, 0.0 }
 0x126   :  { %v597_v10 = vadd.f32 %v596_v49, %v595_v38  ;;  %v606_v38 = vsel %vm532_vm3, %v1709_v2, 0.0 }
 0x128   :  { %v599_v12 = vadd.f32 %v598_v11, %v597_v10  ;;  %v608_v10 = vsel %vm532_vm3, %v1719_v7, 0.0  ;;  %v1851_v58 = vpop.f32.mrf.mxu2 }
 0x12a   :  { %v601_v17 = vadd.f32 %v600_v13, %v599_v12  ;;  %v610_v12 = vsel %vm532_vm3, %v1739_v21, 0.0  ;;  %v1853_v61 = vpop.f32.mrf.mxu3 }
 0x12b   :  { %2944 = vst [vmem:[#allocation14_spill] sm:$0xff] %v1853_v61 }
 0x12c   :  { %v603_v27 = vadd.f32 %v602_v24, %v601_v17  ;;  %v612_v17 = vsel %vm532_vm3, %v1757_v35, 0.0 }
 0x12e   :  { %v605_v32 = vadd.f32 %v604_v25, %v603_v27  ;;  %v614_v27 = vsel %vm532_vm3, %v1775_v20, 0.0 }
 0x130   :  { %v607_v49 = vadd.f32 %v606_v38, %v605_v32  ;;  %v616_v32 = vsel %vm532_vm3, %v1791_v6, 0.0  ;;  %v1865_v35 = vpop.f32.mrf.mxu2 }
 0x132   :  { %v609_v11 = vadd.f32 %v608_v10, %v607_v49  ;;  %v618_v49 = vsel %vm532_vm3, %v1807_v30, 0.0  ;;  %v1867_v20 = vpop.f32.mrf.mxu3 }
 0x133   :  { %2945 = vst [vmem:[#allocation15_spill] sm:$0xff] %v1867_v20 }
 0x134   :  { %v611_v13 = vadd.f32 %v610_v12, %v609_v11  ;;  %v620_v11 = vsel %vm532_vm3, %v1823_v28, 0.0 }
 0x136   :  { %v613_v24 = vadd.f32 %v612_v17, %v611_v13  ;;  %v622_v13 = vsel %vm532_vm3, %v1837_v34, 0.0 }
 0x138   :  { %v615_v25 = vadd.f32 %v614_v27, %v613_v24  ;;  %v624_v24 = vsel %vm532_vm3, %v1851_v58, 0.0 }
 0x13a   :  { %v617_v38 = vadd.f32 %v616_v32, %v615_v25  ;;  %v626_v25 = vsel %vm532_vm3, %v1865_v35, 0.0  ;;  %v1879_v34 = vpop.f32.mrf.mxu3 }
 0x13b   :  { %2946 = vst [vmem:[#allocation16_spill] sm:$0xff] %v1879_v34 }
 0x13c   :  { %v619_v10 = vadd.f32 %v618_v49, %v617_v38  ;;  %v628_v38 = vsel %vm532_vm3, %v1703_v63, 0.0 }
 0x13e   :  { %v621_v12 = vadd.f32 %v620_v11, %v619_v10  ;;  %v630_v10 = vsel %vm532_vm3, %v1711_v3, 0.0 }
 0x140   :  { %v623_v17 = vadd.f32 %v622_v13, %v621_v12  ;;  %v632_v12 = vsel %vm532_vm3, %v1721_v8, 0.0 }
 0x142   :  { %v625_v27 = vadd.f32 %v624_v24, %v623_v17  ;;  %v634_v17 = vsel %vm532_vm3, %v1741_v23, 0.0  ;;  %v1891_v8 = vpop.f32.mrf.mxu3 }
 0x143   :  { %2947 = vst [vmem:[#allocation17_spill] sm:$0xff] %v1891_v8 }
 0x144   :  { %v627_v32 = vadd.f32 %v626_v25, %v625_v27  ;;  %v636_v27 = vsel %vm532_vm3, %v1761_v43, 0.0 }
 0x146   :  { %v629_v49 = vadd.f32 %v628_v38, %v627_v32  ;;  %v638_v32 = vsel %vm532_vm3, %v1777_v22, 0.0 }
 0x148   :  { %v631_v11 = vadd.f32 %v630_v10, %v629_v49  ;;  %v640_v49 = vsel %vm532_vm3, %v1793_v9, 0.0 }
 0x14a   :  { %v633_v13 = vadd.f32 %v632_v12, %v631_v11  ;;  %v642_v11 = vsel %vm532_vm3, %v1809_v31, 0.0  ;;  %v1901_v31 = vpop.f32.mrf.mxu3 }
 0x14b   :  { %2948 = vst [vmem:[#allocation18_spill] sm:$0xff] %v1901_v31 }
 0x14c   :  { %v635_v24 = vadd.f32 %v634_v17, %v633_v13  ;;  %v644_v13 = vsel %vm532_vm3, %v1825_v29, 0.0 }
 0x14e   :  { %v637_v25 = vadd.f32 %v636_v27, %v635_v24  ;;  %v646_v24 = vsel %vm532_vm3, %v1839_v18, 0.0 }
 0x150   :  { %v639_v38 = vadd.f32 %v638_v32, %v637_v25  ;;  %v648_v25 = vsel %vm532_vm3, %v1853_v61, 0.0 }
 0x152   :  { %v641_v10 = vadd.f32 %v640_v49, %v639_v38  ;;  %v650_v38 = vsel %vm532_vm3, %v1867_v20, 0.0  ;;  %v1909_v61 = vpop.f32.mrf.mxu3 }
 0x154   :  { %v643_v12 = vadd.f32 %v642_v11, %v641_v10  ;;  %v652_v10 = vsel %vm532_vm3, %v1879_v34, 0.0 }
 0x156   :  { %v645_v17 = vadd.f32 %v644_v13, %v643_v12  ;;  %v654_v12 = vsel %vm532_vm3, %v1891_v8, 0.0 }
 0x158   :  { %v647_v27 = vadd.f32 %v646_v24, %v645_v17  ;;  %v656_v17 = vsel %vm532_vm3, %v1901_v31, 0.0 }
 0x15a   :  { %v649_v32 = vadd.f32 %v648_v25, %v647_v27  ;;  %v658_v27 = vsel %vm532_vm3, %v1909_v61, 0.0 }
 0x15c   :  { %v651_v49 = vadd.f32 %v650_v38, %v649_v32  ;;  %v1494_v32 = vmov 512.0  }
 0x15d   :  { %1489 = vrcp.f32 %v1494_v32 }
 0x15e   :  { %v653_v11 = vadd.f32 %v652_v10, %v651_v49 }
 0x160   :  { %v655_v13 = vadd.f32 %v654_v12, %v653_v11 }
 0x162   :  { %v657_v24 = vadd.f32 %v656_v17, %v655_v13 }
 0x163   :  { %v1490_v20 = vpop.eup %1489 }
 0x164   :  { %v659_v25 = vadd.f32 %v658_v27, %v657_v24  ;;  %v667_v49 = vmul.f32 512.0, %v1490_v20  ;;  %vm671_vm4 = vweird.f32 %v1490_v20 }
 0x166   :  { %v660_v38 = vrot.slane %v659_v25, 4  ;;  %v668_v18 = vsub.f32 1.0, %v667_v49 }
 0x168   :  { %v661_v34 = vadd.f32 %v660_v38, %v659_v25  ;;  %v669_v11 = vmul.f32 %v1490_v20, %v668_v18 }
 0x16a   :  { %v662_v10 = vrot.slane %v661_v34, 2  ;;  %v670_v29 = vadd.f32 %v1490_v20, %v669_v11 }
 0x16c   :  { %v663_v8 = vadd.f32 %v662_v10, %v661_v34  ;;  %v1913_v17 = vsel %vm671_vm4, %v1490_v20, %v670_v29 }
 0x16e   :  { %v664_v12 = vrot.slane %v663_v8, 1 }
 0x170   :  { %v665_v13 = vadd.f32 %v664_v12, %v663_v8 }
 0x172   :  { %v1916_v31 = vmul.f32 %v1913_v17, %v665_v13 }
 0x174   :  { %v1920_v24 = vsub.f32 %v1641_v36, %v1916_v31  ;;  %v1924_v27 = vsub.f32 %v1653_v40, %v1916_v31  ;;  %v1928_v34 = vsub.f32 %v1657_v42, %v1916_v31  ;;  %v1932_v8 = vsub.f32 %v1665_v45, %v1916_v31 }
 0x175   :  { %v1940_v36 = vsub.f32 %v1671_v48, %v1916_v31  ;;  %v1946_v42 = vsub.f32 %v1677_v50, %v1916_v31  ;;  %v1954_v38 = vsub.f32 %v1683_v53, %v1916_v31  ;;  %v1961_v50 = vsub.f32 %v1689_v56, %v1916_v31 }
 0x176   :  { %v738_v20 = vmul.f32 %v1920_v24, %v1920_v24  ;;  %v739_v18 = vmul.f32 %v1924_v27, %v1924_v27  ;;  %v740_v40 = vmul.f32 %v1928_v34, %v1928_v34  ;;  %v741_v45 = vmul.f32 %v1932_v8, %v1932_v8 }
 0x177   :  { %v742_v48 = vmul.f32 %v1940_v36, %v1940_v36  ;;  %v743_v11 = vmul.f32 %v1946_v42, %v1946_v42  ;;  %v1968_v53 = vsub.f32 %v1695_v59, %v1916_v31  ;;  %v1975_v56 = vsub.f32 %v1701_v62, %v1916_v31 }
 0x178   :  { %v802_v29 = vsel %vm532_vm3, %v738_v20, 0.0  ;;  %v803_v25 = vsel %vm532_vm3, %v739_v18, 0.0  ;;  %v805_v49 = vsel %vm532_vm3, %v740_v40, 0.0  ;;  %v807_v12 = vsel %vm532_vm3, %v741_v45, 0.0 }
 0x179   :  { %v804_v32 = vadd.f32 %v803_v25, %v802_v29  ;;  %v744_v20 = vmul.f32 %v1954_v38, %v1954_v38  ;;  %v809_v18 = vsel %vm532_vm3, %v742_v48, 0.0  ;;  %v745_v29 = vmul.f32 %v1961_v50, %v1961_v50 }
 0x17a   :  { %v811_v45 = vsel %vm532_vm3, %v743_v11, 0.0  ;;  %v1982_v59 = vsub.f32 %v1705_v0, %v1916_v31  ;;  %v1989_v62 = vsub.f32 %v1713_v4, %v1916_v31  ;;  %v1996_v0 = vsub.f32 %v1729_v14, %v1916_v31 }
 0x17b   :  { %v806_v10 = vadd.f32 %v805_v49, %v804_v32  ;;  %v746_v32 = vmul.f32 %v1968_v53, %v1968_v53  ;;  %v813_v48 = vsel %vm532_vm3, %v744_v20, 0.0  ;;  %v815_v11 = vsel %vm532_vm3, %v745_v29, 0.0 }
 0x17c   :  { %v2003_v4 = vsub.f32 %v1745_v26, %v1916_v31  ;;  %v2010_v14 = vsub.f32 %v1759_v39, %v1916_v31  ;;  %v2017_v26 = vsub.f32 %v1769_v15, %v1916_v31  ;;  %v2024_v39 = vsub.f32 %v1643_v37, %v1916_v31 }
 0x17d   :  { %v808_v13 = vadd.f32 %v807_v12, %v806_v10  ;;  %v747_v10 = vmul.f32 %v1975_v56, %v1975_v56  ;;  %v817_v20 = vsel %vm532_vm3, %v746_v32, 0.0  ;;  %v2031_v15 = vsub.f32 %v1655_v41, %v1916_v31 }
 0x17e   :  { %v2038_v37 = vsub.f32 %v1662_v44, %v1916_v31  ;;  %v2045_v41 = vsub.f32 %v1667_v46, %v1916_v31  ;;  %v2052_v44 = vsub.f32 %v1679_v51, %v1916_v31  ;;  %v2059_v46 = vsub.f32 %v1685_v54, %v1916_v31 }
 0x17f   :  { %v810_v40 = vadd.f32 %v809_v18, %v808_v13  ;;  %v748_v13 = vmul.f32 %v1982_v59, %v1982_v59  ;;  %v819_v29 = vsel %vm532_vm3, %v747_v10, 0.0  ;;  %v2066_v51 = vsub.f32 %v1691_v57, %v1916_v31 }
 0x180   :  { %v2073_v54 = vsub.f32 %v1697_v60, %v1916_v31  ;;  %v2080_v57 = vsub.f32 %v1707_v1, %v1916_v31  ;;  %v2087_v60 = vsub.f32 %v1715_v5, %v1916_v31  ;;  %v2094_v1 = vsub.f32 %v1735_v19, %v1916_v31 }
 0x181   :  { %v812_v25 = vadd.f32 %v811_v45, %v810_v40  ;;  %v749_v40 = vmul.f32 %v1989_v62, %v1989_v62  ;;  %v821_v32 = vsel %vm532_vm3, %v748_v13, 0.0  ;;  %v2101_v5 = vsub.f32 %v1753_v33, %v1916_v31 }
 0x182   :  { %v2108_v19 = vsub.f32 %v1771_v16, %v1916_v31 }
 0x183   :  { %v814_v49 = vadd.f32 %v813_v48, %v812_v25  ;;  %v750_v25 = vmul.f32 %v1996_v0, %v1996_v0  ;;  %v823_v10 = vsel %vm532_vm3, %v749_v40, 0.0 }
 0x185   :  { %v816_v12 = vadd.f32 %v815_v11, %v814_v49  ;;  %v751_v49 = vmul.f32 %v2003_v4, %v2003_v4  ;;  %v825_v13 = vsel %vm532_vm3, %v750_v25, 0.0 }
 0x187   :  { %v818_v18 = vadd.f32 %v817_v20, %v816_v12  ;;  %v752_v12 = vmul.f32 %v2010_v14, %v2010_v14  ;;  %v827_v40 = vsel %vm532_vm3, %v751_v49, 0.0 }
 0x189   :  { %v820_v45 = vadd.f32 %v819_v29, %v818_v18  ;;  %v753_v18 = vmul.f32 %v2017_v26, %v2017_v26  ;;  %v829_v25 = vsel %vm532_vm3, %v752_v12, 0.0 }
 0x18b   :  { %v822_v48 = vadd.f32 %v821_v32, %v820_v45  ;;  %v754_v45 = vmul.f32 %v2024_v39, %v2024_v39  ;;  %v831_v49 = vsel %vm532_vm3, %v753_v18, 0.0 }
 0x18d   :  { %v824_v11 = vadd.f32 %v823_v10, %v822_v48  ;;  %v755_v48 = vmul.f32 %v2031_v15, %v2031_v15  ;;  %v833_v12 = vsel %vm532_vm3, %v754_v45, 0.0 }
 0x18f   :  { %v826_v20 = vadd.f32 %v825_v13, %v824_v11  ;;  %v756_v11 = vmul.f32 %v2038_v37, %v2038_v37  ;;  %v835_v18 = vsel %vm532_vm3, %v755_v48, 0.0 }
 0x191   :  { %v828_v29 = vadd.f32 %v827_v40, %v826_v20  ;;  %v757_v20 = vmul.f32 %v2045_v41, %v2045_v41  ;;  %v837_v45 = vsel %vm532_vm3, %v756_v11, 0.0 }
 0x193   :  { %v830_v32 = vadd.f32 %v829_v25, %v828_v29  ;;  %v758_v29 = vmul.f32 %v2052_v44, %v2052_v44  ;;  %v839_v48 = vsel %vm532_vm3, %v757_v20, 0.0 }
 0x195   :  { %v832_v10 = vadd.f32 %v831_v49, %v830_v32  ;;  %v759_v32 = vmul.f32 %v2059_v46, %v2059_v46  ;;  %v841_v11 = vsel %vm532_vm3, %v758_v29, 0.0 }
 0x197   :  { %v834_v13 = vadd.f32 %v833_v12, %v832_v10  ;;  %v760_v10 = vmul.f32 %v2066_v51, %v2066_v51  ;;  %v843_v20 = vsel %vm532_vm3, %v759_v32, 0.0 }
 0x199   :  { %v836_v40 = vadd.f32 %v835_v18, %v834_v13  ;;  %v761_v13 = vmul.f32 %v2073_v54, %v2073_v54  ;;  %v845_v29 = vsel %vm532_vm3, %v760_v10, 0.0 }
 0x19b   :  { %v838_v25 = vadd.f32 %v837_v45, %v836_v40  ;;  %v762_v40 = vmul.f32 %v2080_v57, %v2080_v57  ;;  %v847_v32 = vsel %vm532_vm3, %v761_v13, 0.0 }
 0x19d   :  { %v840_v49 = vadd.f32 %v839_v48, %v838_v25  ;;  %v763_v25 = vmul.f32 %v2087_v60, %v2087_v60  ;;  %v849_v10 = vsel %vm532_vm3, %v762_v40, 0.0 }
 0x19f   :  { %v842_v12 = vadd.f32 %v841_v11, %v840_v49  ;;  %v764_v49 = vmul.f32 %v2094_v1, %v2094_v1  ;;  %v851_v13 = vsel %vm532_vm3, %v763_v25, 0.0 }
 0x1a1   :  { %v844_v18 = vadd.f32 %v843_v20, %v842_v12  ;;  %v2949_v12 = vld [vmem:[#allocation7_spill] sm:$0xff]  ;;  %v765_v20 = vmul.f32 %v2101_v5, %v2101_v5  ;;  %v853_v40 = vsel %vm532_vm3, %v764_v49, 0.0 }
 0x1a2   :  { %v2115_v33 = vsub.f32 %v2949_v12, %v1916_v31 }
 0x1a3   :  { %v846_v45 = vadd.f32 %v845_v29, %v844_v18  ;;  %v2950_v29 = vld [vmem:[#allocation8_spill] sm:$0xff]  ;;  %v855_v25 = vsel %vm532_vm3, %v765_v20, 0.0 }
 0x1a4   :  { %v2122_v16 = vsub.f32 %v2950_v29, %v1916_v31  ;;  %v767_v12 = vmul.f32 %v2115_v33, %v2115_v33 }
 0x1a5   :  { %v848_v48 = vadd.f32 %v847_v32, %v846_v45  ;;  %v766_v45 = vmul.f32 %v2108_v19, %v2108_v19 }
 0x1a6   :  { %v768_v29 = vmul.f32 %v2122_v16, %v2122_v16  ;;  %v859_v20 = vsel %vm532_vm3, %v767_v12, 0.0 }
 0x1a7   :  { %v850_v11 = vadd.f32 %v849_v10, %v848_v48  ;;  %v2951_v48 = vld [vmem:[#allocation10_spill] sm:$0xff]  ;;  %v857_v49 = vsel %vm532_vm3, %v766_v45, 0.0 }
 0x1a8   :  { %v2129_v10 = vsub.f32 %v2951_v48, %v1916_v31  ;;  %v861_v45 = vsel %vm532_vm3, %v768_v29, 0.0 }
 0x1a9   :  { %v852_v18 = vadd.f32 %v851_v13, %v850_v11  ;;  %v2136_v13 = vsub.f32 %v1669_v47, %v1916_v31  ;;  %v2150_v47 = vsub.f32 %v1687_v55, %v1916_v31 }
 0x1aa   :  { %2952 = vst [vmem:[#allocation7_spill] sm:$0xff] %v2129_v10  ;;  %v769_v48 = vmul.f32 %v2129_v10, %v2129_v10 }
 0x1ab   :  { %v854_v32 = vadd.f32 %v853_v40, %v852_v18  ;;  %2953 = vst [vmem:[#allocation8_spill] sm:$0xff] %v2136_v13  ;;  %v2143_v40 = vsub.f32 %v1681_v52, %v1916_v31 }
 0x1ac   :  { %v863_v12 = vsel %vm532_vm3, %v769_v48, 0.0 }
 0x1ad   :  { %v856_v11 = vadd.f32 %v855_v25, %v854_v32  ;;  %v770_v25 = vmul.f32 %v2136_v13, %v2136_v13  ;;  %v771_v10 = vmul.f32 %v2143_v40, %v2143_v40  ;;  %v772_v13 = vmul.f32 %v2150_v47, %v2150_v47 }
 0x1af   :  { %v858_v18 = vadd.f32 %v857_v49, %v856_v11  ;;  %v2954_v49 = vld [vmem:[#allocation2_spill] sm:$0xff]  ;;  %v865_v29 = vsel %vm532_vm3, %v770_v25, 0.0  ;;  %v867_v48 = vsel %vm532_vm3, %v771_v10, 0.0  ;;  %v869_v25 = vsel %vm532_vm3, %v772_v13, 0.0 }
 0x1b0   :  { %v2157_v52 = vsub.f32 %v2954_v49, %v1916_v31 }
 0x1b1   :  { %v860_v32 = vadd.f32 %v859_v20, %v858_v18  ;;  %v2955_v20 = vld [vmem:[#allocation3_spill] sm:$0xff] }
 0x1b2   :  { %v2164_v55 = vsub.f32 %v2955_v20, %v1916_v31  ;;  %v773_v49 = vmul.f32 %v2157_v52, %v2157_v52 }
 0x1b3   :  { %v862_v11 = vadd.f32 %v861_v45, %v860_v32  ;;  %v2171_v45 = vsub.f32 %v1709_v2, %v1916_v31  ;;  %v2185_v2 = vsub.f32 %v1739_v21, %v1916_v31 }
 0x1b4   :  { %2956 = vst [vmem:[#allocation10_spill] sm:$0xff] %v2164_v55  ;;  %v774_v20 = vmul.f32 %v2164_v55, %v2164_v55  ;;  %v871_v10 = vsel %vm532_vm3, %v773_v49, 0.0 }
 0x1b5   :  { %v864_v18 = vadd.f32 %v863_v12, %v862_v11  ;;  %2957 = vst [vmem:[#allocation2_spill] sm:$0xff] %v2171_v45  ;;  %v2178_v12 = vsub.f32 %v1719_v7, %v1916_v31 }
 0x1b6   :  { %v873_v13 = vsel %vm532_vm3, %v774_v20, 0.0 }
 0x1b7   :  { %v866_v32 = vadd.f32 %v865_v29, %v864_v18  ;;  %v775_v29 = vmul.f32 %v2171_v45, %v2171_v45  ;;  %v776_v55 = vmul.f32 %v2178_v12, %v2178_v12  ;;  %v777_v45 = vmul.f32 %v2185_v2, %v2185_v2 }
 0x1b9   :  { %v868_v11 = vadd.f32 %v867_v48, %v866_v32  ;;  %v2958_v48 = vld [vmem:[#allocation5_spill] sm:$0xff]  ;;  %v875_v49 = vsel %vm532_vm3, %v775_v29, 0.0  ;;  %v877_v20 = vsel %vm532_vm3, %v776_v55, 0.0  ;;  %v879_v29 = vsel %vm532_vm3, %v777_v45, 0.0 }
 0x1ba   :  { %v2192_v7 = vsub.f32 %v2958_v48, %v1916_v31 }
 0x1bb   :  { %v870_v18 = vadd.f32 %v869_v25, %v868_v11  ;;  %v2959_v25 = vld [vmem:[#allocation6_spill] sm:$0xff] }
 0x1bc   :  { %v2199_v21 = vsub.f32 %v2959_v25, %v1916_v31  ;;  %v778_v48 = vmul.f32 %v2192_v7, %v2192_v7 }
 0x1bd   :  { %v872_v32 = vadd.f32 %v871_v10, %v870_v18  ;;  %v2206_v10 = vsub.f32 %v1791_v6, %v1916_v31  ;;  %v2220_v6 = vsub.f32 %v1823_v28, %v1916_v31  ;;  %v2234_v28 = vsub.f32 %v1851_v58, %v1916_v31 }
 0x1be   :  { %2960 = vst [vmem:[#allocation3_spill] sm:$0xff] %v2199_v21  ;;  %v779_v25 = vmul.f32 %v2199_v21, %v2199_v21  ;;  %v881_v55 = vsel %vm532_vm3, %v778_v48, 0.0  ;;  %v2248_v58 = vsub.f32 %v1703_v63, %v1916_v31 }
 0x1bf   :  { %v874_v11 = vadd.f32 %v873_v13, %v872_v32  ;;  %v2213_v13 = vsub.f32 %v1807_v30, %v1916_v31  ;;  %2962 = vst [vmem:[#allocation5_spill] sm:$0xff] %v2234_v28 }
 0x1c0   :  { %v883_v45 = vsel %vm532_vm3, %v779_v25, 0.0  ;;  %2963 = vst [vmem:[#allocation6_spill] sm:$0xff] %v2248_v58 }
 0x1c1   :  { %v876_v18 = vadd.f32 %v875_v49, %v874_v11  ;;  %v780_v49 = vmul.f32 %v2206_v10, %v2206_v10  ;;  %v781_v21 = vmul.f32 %v2213_v13, %v2213_v13 }
 0x1c3   :  { %v878_v32 = vadd.f32 %v877_v20, %v876_v18  ;;  %v2961_v20 = vld [vmem:[#allocation12_spill] sm:$0xff]  ;;  %v885_v48 = vsel %vm532_vm3, %v780_v49, 0.0  ;;  %v887_v25 = vsel %vm532_vm3, %v781_v21, 0.0 }
 0x1c4   :  { %v2227_v30 = vsub.f32 %v2961_v20, %v1916_v31 }
 0x1c5   :  { %v880_v11 = vadd.f32 %v879_v29, %v878_v32  ;;  %v782_v29 = vmul.f32 %v2220_v6, %v2220_v6 }
 0x1c6   :  { %v783_v20 = vmul.f32 %v2227_v30, %v2227_v30 }
 0x1c7   :  { %v882_v18 = vadd.f32 %v881_v55, %v880_v11  ;;  %v2241_v55 = vsub.f32 %v1865_v35, %v1916_v31  ;;  %v889_v49 = vsel %vm532_vm3, %v782_v29, 0.0  ;;  %v2255_v35 = vsub.f32 %v1711_v3, %v1916_v31 }
 0x1c8   :  { %v891_v21 = vsel %vm532_vm3, %v783_v20, 0.0  ;;  %v2269_v3 = vsub.f32 %v1741_v23, %v1916_v31  ;;  %v2283_v23 = vsub.f32 %v1777_v22, %v1916_v31 }
 0x1c9   :  { %v884_v32 = vadd.f32 %v883_v45, %v882_v18  ;;  %v784_v45 = vmul.f32 %v2234_v28, %v2234_v28  ;;  %2964 = vst [vmem:[#allocation12_spill] sm:$0xff] %v2255_v35  ;;  %v786_v28 = vmul.f32 %v2248_v58, %v2248_v58 }
 0x1ca   :  { %2967 = vst [vmem:[#allocation19_spill] sm:$0xff] %v2269_v3 }
 0x1cb   :  { %v886_v11 = vadd.f32 %v885_v48, %v884_v32  ;;  %v785_v48 = vmul.f32 %v2241_v55, %v2241_v55  ;;  %v893_v29 = vsel %vm532_vm3, %v784_v45, 0.0  ;;  %v897_v45 = vsel %vm532_vm3, %v786_v28, 0.0  ;;  %2969 = vst [vmem:[#allocation21_spill] sm:$0xff] %v2283_v23 }
 0x1cd   :  { %v888_v18 = vadd.f32 %v887_v25, %v886_v11  ;;  %v2965_v25 = vld [vmem:[#allocation4_spill] sm:$0xff]  ;;  %v895_v20 = vsel %vm532_vm3, %v785_v48, 0.0 }
 0x1ce   :  { %v2262_v63 = vsub.f32 %v2965_v25, %v1916_v31 }
 0x1cf   :  { %v890_v32 = vadd.f32 %v889_v49, %v888_v18  ;;  %v787_v49 = vmul.f32 %v2255_v35, %v2255_v35 }
 0x1d0   :  { %2966 = vst [vmem:[#allocation4_spill] sm:$0xff] %v2262_v63  ;;  %v788_v25 = vmul.f32 %v2262_v63, %v2262_v63 }
 0x1d1   :  { %v892_v11 = vadd.f32 %v891_v21, %v890_v32  ;;  %v2276_v21 = vsub.f32 %v1761_v43, %v1916_v31  ;;  %v899_v48 = vsel %vm532_vm3, %v787_v49, 0.0  ;;  %v2290_v43 = vsub.f32 %v1793_v9, %v1916_v31 }
 0x1d2   :  { %v901_v28 = vsel %vm532_vm3, %v788_v25, 0.0 }
 0x1d3   :  { %v894_v18 = vadd.f32 %v893_v29, %v892_v11  ;;  %2968 = vst [vmem:[#allocation20_spill] sm:$0xff] %v2276_v21  ;;  %v789_v29 = vmul.f32 %v2269_v3, %v2269_v3  ;;  %v791_v3 = vmul.f32 %v2283_v23, %v2283_v23 }
 0x1d4   :  { %2970 = vst [vmem:[#allocation22_spill] sm:$0xff] %v2290_v43 }
 0x1d5   :  { %v896_v32 = vadd.f32 %v895_v20, %v894_v18  ;;  %v790_v20 = vmul.f32 %v2276_v21, %v2276_v21  ;;  %v903_v49 = vsel %vm532_vm3, %v789_v29, 0.0  ;;  %v792_v21 = vmul.f32 %v2290_v43, %v2290_v43 }
 0x1d6   :  { %v907_v29 = vsel %vm532_vm3, %v791_v3, 0.0 }
 0x1d7   :  { %v898_v11 = vadd.f32 %v897_v45, %v896_v32  ;;  %v2971_v45 = vld [vmem:[#allocation9_spill] sm:$0xff]  ;;  %v905_v25 = vsel %vm532_vm3, %v790_v20, 0.0  ;;  %v909_v20 = vsel %vm532_vm3, %v792_v21, 0.0 }
 0x1d8   :  { %v2297_v22 = vsub.f32 %v2971_v45, %v1916_v31 }
 0x1d9   :  { %v900_v18 = vadd.f32 %v899_v48, %v898_v11  ;;  %v2973_v48 = vld [vmem:[#allocation11_spill] sm:$0xff] }
 0x1da   :  { %2972 = vst [vmem:[#allocation9_spill] sm:$0xff] %v2297_v22  ;;  %v2304_v9 = vsub.f32 %v2973_v48, %v1916_v31  ;;  %v793_v23 = vmul.f32 %v2297_v22, %v2297_v22 }
 0x1db   :  { %v902_v32 = vadd.f32 %v901_v28, %v900_v18  ;;  %v2975_v28 = vld [vmem:[#allocation13_spill] sm:$0xff] }
 0x1dc   :  { %2974 = vst [vmem:[#allocation11_spill] sm:$0xff] %v2304_v9  ;;  %v2311_v45 = vsub.f32 %v2975_v28, %v1916_v31  ;;  %v794_v43 = vmul.f32 %v2304_v9, %v2304_v9  ;;  %v911_v3 = vsel %vm532_vm3, %v793_v23, 0.0 }
 0x1dd   :  { %v904_v11 = vadd.f32 %v903_v49, %v902_v32  ;;  %v2977_v49 = vld [vmem:[#allocation14_spill] sm:$0xff] }
 0x1de   :  { %2976 = vst [vmem:[#allocation13_spill] sm:$0xff] %v2311_v45  ;;  %v2318_v48 = vsub.f32 %v2977_v49, %v1916_v31  ;;  %v795_v22 = vmul.f32 %v2311_v45, %v2311_v45  ;;  %v913_v21 = vsel %vm532_vm3, %v794_v43, 0.0 }
 0x1df   :  { %v906_v18 = vadd.f32 %v905_v25, %v904_v11  ;;  %v2979_v25 = vld [vmem:[#allocation15_spill] sm:$0xff] }
 0x1e0   :  { %2978 = vst [vmem:[#allocation14_spill] sm:$0xff] %v2318_v48  ;;  %v2325_v28 = vsub.f32 %v2979_v25, %v1916_v31  ;;  %v796_v9 = vmul.f32 %v2318_v48, %v2318_v48  ;;  %v915_v23 = vsel %vm532_vm3, %v795_v22, 0.0  ;;  %v2985_v48 = vld [vmem:[#allocation18_spill] sm:$0xff] }
 0x1e1   :  { %v908_v32 = vadd.f32 %v907_v29, %v906_v18  ;;  %v2981_v29 = vld [vmem:[#allocation16_spill] sm:$0xff]  ;;  %v2349_v43 = vsub.f32 %v2985_v48, %v1916_v31 }
 0x1e2   :  { %2980 = vst [vmem:[#allocation15_spill] sm:$0xff] %v2325_v28  ;;  %v2332_v49 = vsub.f32 %v2981_v29, %v1916_v31  ;;  %v797_v45 = vmul.f32 %v2325_v28, %v2325_v28  ;;  %v917_v29 = vsel %vm532_vm3, %v796_v9, 0.0 }
 0x1e3   :  { %v910_v11 = vadd.f32 %v909_v20, %v908_v32  ;;  %v2983_v20 = vld [vmem:[#allocation17_spill] sm:$0xff]  ;;  %2986 = vst [vmem:[#allocation18_spill] sm:$0xff] %v2349_v43  ;;  %v800_v9 = vmul.f32 %v2349_v43, %v2349_v43 }
 0x1e4   :  { %2982 = vst [vmem:[#allocation16_spill] sm:$0xff] %v2332_v49  ;;  %v2339_v25 = vsub.f32 %v2983_v20, %v1916_v31 }
 0x1e5   :  { %v912_v18 = vadd.f32 %v911_v3, %v910_v11  ;;  %v798_v3 = vmul.f32 %v2332_v49, %v2332_v49 }
 0x1e6   :  { %2984 = vst [vmem:[#allocation17_spill] sm:$0xff] %v2339_v25 }
 0x1e7   :  { %v914_v32 = vadd.f32 %v913_v21, %v912_v18  ;;  %v799_v18 = vmul.f32 %v2339_v25, %v2339_v25  ;;  %v919_v21 = vsel %vm532_vm3, %v797_v45, 0.0  ;;  %v921_v28 = vsel %vm532_vm3, %v798_v3, 0.0 }
 0x1e9   :  { %v916_v11 = vadd.f32 %v915_v23, %v914_v32  ;;  %v737_v32 = vsub.f32 %v1909_v61, %v1916_v31  ;;  %v923_v23 = vsel %vm532_vm3, %v799_v18, 0.0 }
 0x1eb   :  { %v918_v63 = vadd.f32 %v917_v29, %v916_v11  ;;  %v801_v48 = vmul.f32 %v737_v32, %v737_v32  ;;  %v925_v29 = vsel %vm532_vm3, %v800_v9, 0.0 }
 0x1ed   :  { %v920_v20 = vadd.f32 %v919_v21, %v918_v63  ;;  %v927_v25 = vsel %vm532_vm3, %v801_v48, 0.0 }
 0x1ef   :  { %v922_v22 = vadd.f32 %v921_v28, %v920_v20 }
 0x1f1   :  { %v924_v11 = vadd.f32 %v923_v23, %v922_v22 }
 0x1f3   :  { %v926_v49 = vadd.f32 %v925_v29, %v924_v11 }
 0x1f5   :  { %v928_v45 = vadd.f32 %v927_v25, %v926_v49 }
 0x1f7   :  { %v929_v63 = vrot.slane %v928_v45, 4 }
 0x1f9   :  { %v930_v21 = vadd.f32 %v929_v63, %v928_v45 }
 0x1fb   :  { %v931_v3 = vrot.slane %v930_v21, 2 }
 0x1fd   :  { %v932_v28 = vadd.f32 %v931_v3, %v930_v21 }
 0x1ff   :  { %v933_v20 = vrot.slane %v932_v28, 1 }
 0x201   :  { %v934_v35 = vadd.f32 %v933_v20, %v932_v28 }
 0x203   :  { %v935_v61 = vmul.f32 %v934_v35, %v1913_v17  ;;  %v2374_v35 = vld [vmem:[%s2891_s2] ss:$0 sm:$0xff] }
 0x205   :  { %v936_v31 = vadd.f32 1e-05, %v935_v61 }
 0x207   :  { %1491 = vrsqrt.f32 %v936_v31  ;;  %vm943_vm6 = vweird.f32 %v936_v31 }
 0x20d   :  { %v1492_v43 = vpop.eup %1491 }
 0x20e   :  { %v938_v18 = vmul.f32 %v1492_v43, %v936_v31  ;;  %vm944_vm5 = vweird.f32 %v1492_v43 }
 0x20f   :  { %vm945_vm7 = vmor %vm943_vm6, %vm944_vm5 }
 0x210   :  { %v939_v22 = vmul.f32 %v1492_v43, %v938_v18 }
 0x212   :  { %v940_v23 = vmul.f32 0.5, %v939_v22 }
 0x214   :  { %v941_v58 = vsub.f32 1.5, %v940_v23 }
 0x216   :  { %v942_v9 = vmul.f32 %v1492_v43, %v941_v58 }
 0x218   :  { %v2363_v49 = vsel %vm945_vm7, %v1492_v43, %v942_v9 }
 0x219   :  { %v947_v25 = vmul.f32 %v2363_v49, %v1920_v24  ;;  %v948_v11 = vmul.f32 %v2363_v49, %v1924_v27  ;;  %v949_v17 = vmul.f32 %v2363_v49, %v1928_v34  ;;  %v950_v58 = vmul.f32 %v2363_v49, %v1932_v8  ;;  %v2391_v8 = vld [vmem:[%s2892_s3] ss:$0 sm:$0xff] }
 0x21a   :  { %v951_v43 = vmul.f32 %v2363_v49, %v1940_v36  ;;  %v952_v24 = vmul.f32 %v2363_v49, %v1946_v42  ;;  %v1010_v48 = vmul.f32 %v2363_v49, %v737_v32  ;;  %v953_v27 = vmul.f32 %v2363_v49, %v1954_v38 }
 0x21b   :  { %v1014_v34 = vmul.f32 %v2374_v35, %v947_v25  ;;  %v1015_v29 = vmul.f32 %v2374_v35, %v948_v11  ;;  %v1016_v45 = vmul.f32 %v2374_v35, %v949_v17  ;;  %v954_v36 = vmul.f32 %v2363_v49, %v1961_v50 }
 0x21c   :  { %v1017_v42 = vmul.f32 %v2374_v35, %v950_v58  ;;  %v955_v32 = vmul.f32 %v2363_v49, %v1968_v53  ;;  %v1018_v38 = vmul.f32 %v2374_v35, %v951_v43  ;;  %v956_v63 = vmul.f32 %v2363_v49, %v1975_v56 }
 0x21d   :  { %v957_v21 = vmul.f32 %v2363_v49, %v1982_v59  ;;  %v1019_v3 = vmul.f32 %v2374_v35, %v952_v24  ;;  %v1077_v28 = vmul.f32 %v2374_v35, %v1010_v48  ;;  %v1020_v20 = vmul.f32 %v2374_v35, %v953_v27 }
 0x21e   :  { %v1081_v50 = vadd.f32 %v2391_v8, %v1014_v34  ;;  %v1082_v61 = vadd.f32 %v2391_v8, %v1015_v29  ;;  %v1083_v53 = vadd.f32 %v2391_v8, %v1016_v45  ;;  %v958_v31 = vmul.f32 %v2363_v49, %v1989_v62 }
 0x21f   :  { %v959_v56 = vmul.f32 %v2363_v49, %v1996_v0  ;;  %v1021_v59 = vmul.f32 %v2374_v35, %v954_v36  ;;  %v1084_v18 = vadd.f32 %v2391_v8, %v1017_v42  ;;  %v960_v22 = vmul.f32 %v2363_v49, %v2003_v4 }
 0x220   :  { %v961_v23 = vmul.f32 %v2363_v49, %v2010_v14  ;;  %v1022_v9 = vmul.f32 %v2374_v35, %v955_v32  ;;  %v1085_v25 = vadd.f32 %v2391_v8, %v1018_v38  ;;  %v1023_v11 = vmul.f32 %v2374_v35, %v956_v63 }
 0x221   :  { %v1024_v62 = vmul.f32 %v2374_v35, %v957_v21  ;;  %v1086_v0 = vadd.f32 %v2391_v8, %v1019_v3  ;;  %v2425_v17 = vadd.f32 %v2391_v8, %v1077_v28  ;;  %v1087_v58 = vadd.f32 %v2391_v8, %v1020_v20 }
 0x222   :  { %v1145_v43 = vmax.f32 %v1081_v50, 0.0  ;;  %v1146_v4 = vmax.f32 %v1082_v61, 0.0  ;;  %v1147_v24 = vmax.f32 %v1083_v53, 0.0  ;;  %v962_v14 = vmul.f32 %v2363_v49, %v2017_v26 }
 0x223   :  { %v1025_v48 = vmul.f32 %v2374_v35, %v958_v31  ;;  %v1088_v27 = vadd.f32 %v2391_v8, %v1021_v59  ;;  %v1148_v34 = vmax.f32 %v1084_v18, 0.0  ;;  %v963_v29 = vmul.f32 %v2363_v49, %v2024_v39 }
 0x224   :  { %v1026_v45 = vmul.f32 %v2374_v35, %v959_v56  ;;  %v1089_v36 = vadd.f32 %v2391_v8, %v1022_v9  ;;  %v1149_v42 = vmax.f32 %v1085_v25, 0.0  ;;  %1209 = vst.msk [vmem:[%s2893_s4] sm:$0xff] %vm532_vm3, %v1145_v43  ;;  %v964_v26 = vmul.f32 %v2363_v49, %v2031_v15 }
 0x225   :  { %v1027_v32 = vmul.f32 %v2374_v35, %v960_v22  ;;  %v1090_v38 = vadd.f32 %v2391_v8, %v1023_v11  ;;  %v1150_v63 = vmax.f32 %v1086_v0, 0.0  ;;  %1210 = vst.msk [vmem:[%s2893_s4 + $0x8] sm:$0xff] %vm532_vm3, %v1146_v4  ;;  %v965_v39 = vmul.f32 %v2363_v49, %v2038_v37 }
 0x226   :  { %v1028_v21 = vmul.f32 %v2374_v35, %v961_v23  ;;  %v1091_v3 = vadd.f32 %v2391_v8, %v1024_v62  ;;  %v1151_v28 = vmax.f32 %v1087_v58, 0.0  ;;  %1211 = vst.msk [vmem:[%s2893_s4 + $0x10] sm:$0xff] %vm532_vm3, %v1147_v24  ;;  %v966_v15 = vmul.f32 %v2363_v49, %v2045_v41 }
 0x227   :  { %v1029_v20 = vmul.f32 %v2374_v35, %v962_v14  ;;  %v1092_v50 = vadd.f32 %v2391_v8, %v1025_v48  ;;  %v1152_v61 = vmax.f32 %v1088_v27, 0.0  ;;  %1212 = vst.msk [vmem:[%s2893_s4 + $0x18] sm:$0xff] %vm532_vm3, %v1148_v34  ;;  %v967_v37 = vmul.f32 %v2363_v49, %v2052_v44 }
 0x228   :  { %v1030_v53 = vmul.f32 %v2374_v35, %v963_v29  ;;  %v1093_v31 = vadd.f32 %v2391_v8, %v1026_v45  ;;  %v1153_v56 = vmax.f32 %v1089_v36, 0.0  ;;  %1213 = vst.msk [vmem:[%s2893_s4 + $0x20] sm:$0xff] %vm532_vm3, %v1149_v42  ;;  %v968_v41 = vmul.f32 %v2363_v49, %v2059_v46 }
 0x229   :  { %v1031_v59 = vmul.f32 %v2374_v35, %v964_v26  ;;  %v1094_v18 = vadd.f32 %v2391_v8, %v1027_v32  ;;  %v1154_v22 = vmax.f32 %v1090_v38, 0.0  ;;  %1214 = vst.msk [vmem:[%s2893_s4 + $0x28] sm:$0xff] %vm532_vm3, %v1150_v63  ;;  %v969_v44 = vmul.f32 %v2363_v49, %v2066_v51 }
 0x22a   :  { %v1032_v23 = vmul.f32 %v2374_v35, %v965_v39  ;;  %v1095_v9 = vadd.f32 %v2391_v8, %v1028_v21  ;;  %v1155_v25 = vmax.f32 %v1091_v3, 0.0  ;;  %1215 = vst.msk [vmem:[%s2893_s4 + $0x30] sm:$0xff] %vm532_vm3, %v1151_v28  ;;  %v970_v46 = vmul.f32 %v2363_v49, %v2073_v54 }
 0x22b   :  { %v1033_v11 = vmul.f32 %v2374_v35, %v966_v15  ;;  %v1096_v62 = vadd.f32 %v2391_v8, %v1029_v20  ;;  %v1156_v0 = vmax.f32 %v1092_v50, 0.0  ;;  %1216 = vst.msk [vmem:[%s2893_s4 + $0x38] sm:$0xff] %vm532_vm3, %v1152_v61  ;;  %v971_v51 = vmul.f32 %v2363_v49, %v2080_v57 }
 0x22c   :  { %v1034_v58 = vmul.f32 %v2374_v35, %v967_v37  ;;  %v1097_v43 = vadd.f32 %v2391_v8, %v1030_v53  ;;  %v1157_v4 = vmax.f32 %v1093_v31, 0.0  ;;  %1217 = vst.msk [vmem:[%s2893_s4 + $0x40] sm:$0xff] %vm532_vm3, %v1153_v56  ;;  %v972_v54 = vmul.f32 %v2363_v49, %v2087_v60 }
 0x22d   :  { %v1035_v24 = vmul.f32 %v2374_v35, %v968_v41  ;;  %v1098_v14 = vadd.f32 %v2391_v8, %v1031_v59  ;;  %v1158_v48 = vmax.f32 %v1094_v18, 0.0  ;;  %1218 = vst.msk [vmem:[%s2893_s4 + $0x48] sm:$0xff] %vm532_vm3, %v1154_v22  ;;  %v973_v57 = vmul.f32 %v2363_v49, %v2094_v1 }
 0x22e   :  { %v1036_v27 = vmul.f32 %v2374_v35, %v969_v44  ;;  %v1099_v34 = vadd.f32 %v2391_v8, %v1032_v23  ;;  %v1159_v29 = vmax.f32 %v1095_v9, 0.0  ;;  %1219 = vst.msk [vmem:[%s2893_s4 + $0x50] sm:$0xff] %vm532_vm3, %v1155_v25  ;;  %v974_v60 = vmul.f32 %v2363_v49, %v2101_v5 }
 0x22f   :  { %v1037_v45 = vmul.f32 %v2374_v35, %v970_v46  ;;  %v1100_v36 = vadd.f32 %v2391_v8, %v1033_v11  ;;  %v1160_v42 = vmax.f32 %v1096_v62, 0.0  ;;  %1220 = vst.msk [vmem:[%s2893_s4 + $0x58] sm:$0xff] %vm532_vm3, %v1156_v0  ;;  %v975_v1 = vmul.f32 %v2363_v49, %v2108_v19 }
 0x230   :  { %v1038_v26 = vmul.f32 %v2374_v35, %v971_v51  ;;  %v1101_v32 = vadd.f32 %v2391_v8, %v1034_v58  ;;  %v1161_v38 = vmax.f32 %v1097_v43, 0.0  ;;  %1221 = vst.msk [vmem:[%s2893_s4 + $0x60] sm:$0xff] %vm532_vm3, %v1157_v4  ;;  %v976_v5 = vmul.f32 %v2363_v49, %v2115_v33  ;;  %v2987_v33 = vld [vmem:[#allocation7_spill] sm:$0xff] }
 0x231   :  { %v1039_v63 = vmul.f32 %v2374_v35, %v972_v54  ;;  %v1102_v39 = vadd.f32 %v2391_v8, %v1035_v24  ;;  %v1162_v21 = vmax.f32 %v1098_v14, 0.0  ;;  %1222 = vst.msk [vmem:[%s2893_s4 + $0x68] sm:$0xff] %vm532_vm3, %v1158_v48  ;;  %v977_v19 = vmul.f32 %v2363_v49, %v2122_v16  ;;  %v2988_v16 = vld [vmem:[#allocation8_spill] sm:$0xff] }
 0x232   :  { %v1040_v3 = vmul.f32 %v2374_v35, %v973_v57  ;;  %v1103_v28 = vadd.f32 %v2391_v8, %v1036_v27  ;;  %v1163_v15 = vmax.f32 %v1099_v34, 0.0  ;;  %1223 = vst.msk [vmem:[%s2893_s4 + $0x70] sm:$0xff] %vm532_vm3, %v1159_v29  ;;  %v978_v20 = vmul.f32 %v2363_v49, %v2987_v33 }
 0x233   :  { %v1041_v50 = vmul.f32 %v2374_v35, %v974_v60  ;;  %v1104_v61 = vadd.f32 %v2391_v8, %v1037_v45  ;;  %v1164_v37 = vmax.f32 %v1100_v36, 0.0  ;;  %1224 = vst.msk [vmem:[%s2893_s4 + $0x78] sm:$0xff] %vm532_vm3, %v1160_v42  ;;  %v979_v53 = vmul.f32 %v2363_v49, %v2988_v16 }
 0x234   :  { %v1042_v31 = vmul.f32 %v2374_v35, %v975_v1  ;;  %v1105_v56 = vadd.f32 %v2391_v8, %v1038_v26  ;;  %v1165_v41 = vmax.f32 %v1101_v32, 0.0  ;;  %1225 = vst.msk [vmem:[%s2893_s4 + $0x80] sm:$0xff] %vm532_vm3, %v1161_v38  ;;  %v980_v59 = vmul.f32 %v2363_v49, %v2143_v40 }
 0x235   :  { %v1043_v18 = vmul.f32 %v2374_v35, %v976_v5  ;;  %v1106_v22 = vadd.f32 %v2391_v8, %v1039_v63  ;;  %v1166_v44 = vmax.f32 %v1102_v39, 0.0  ;;  %1226 = vst.msk [vmem:[%s2893_s4 + $0x88] sm:$0xff] %vm532_vm3, %v1162_v21  ;;  %v981_v23 = vmul.f32 %v2363_v49, %v2150_v47  ;;  %v2989_v47 = vld [vmem:[#allocation10_spill] sm:$0xff] }
 0x236   :  { %v1044_v9 = vmul.f32 %v2374_v35, %v977_v19  ;;  %v1107_v25 = vadd.f32 %v2391_v8, %v1040_v3  ;;  %v1167_v46 = vmax.f32 %v1103_v28, 0.0  ;;  %1227 = vst.msk [vmem:[%s2893_s4 + $0x90] sm:$0xff] %vm532_vm3, %v1163_v15  ;;  %v982_v40 = vmul.f32 %v2363_v49, %v2157_v52  ;;  %v2990_v52 = vld [vmem:[#allocation2_spill] sm:$0xff] }
 0x237   :  { %v1045_v11 = vmul.f32 %v2374_v35, %v978_v20  ;;  %v1108_v62 = vadd.f32 %v2391_v8, %v1041_v50  ;;  %v1168_v0 = vmax.f32 %v1104_v61, 0.0  ;;  %1228 = vst.msk [vmem:[%s2893_s4 + $0x98] sm:$0xff] %vm532_vm3, %v1164_v37  ;;  %v983_v51 = vmul.f32 %v2363_v49, %v2989_v47 }
 0x238   :  { %v1046_v58 = vmul.f32 %v2374_v35, %v979_v53  ;;  %v1109_v43 = vadd.f32 %v2391_v8, %v1042_v31  ;;  %v1169_v4 = vmax.f32 %v1105_v56, 0.0  ;;  %1229 = vst.msk [vmem:[%s2893_s4 + $0xa0] sm:$0xff] %vm532_vm3, %v1165_v41  ;;  %v984_v54 = vmul.f32 %v2363_v49, %v2990_v52 }
 0x239   :  { %v1047_v24 = vmul.f32 %v2374_v35, %v980_v59  ;;  %v1110_v14 = vadd.f32 %v2391_v8, %v1043_v18  ;;  %v1170_v48 = vmax.f32 %v1106_v22, 0.0  ;;  %1230 = vst.msk [vmem:[%s2893_s4 + $0xa8] sm:$0xff] %vm532_vm3, %v1166_v44  ;;  %v985_v57 = vmul.f32 %v2363_v49, %v2178_v12 }
 0x23a   :  { %v1048_v27 = vmul.f32 %v2374_v35, %v981_v23  ;;  %v1111_v34 = vadd.f32 %v2391_v8, %v1044_v9  ;;  %v1171_v29 = vmax.f32 %v1107_v25, 0.0  ;;  %1231 = vst.msk [vmem:[%s2893_s4 + $0xb0] sm:$0xff] %vm532_vm3, %v1167_v46  ;;  %v986_v60 = vmul.f32 %v2363_v49, %v2185_v2  ;;  %v2991_v2 = vld [vmem:[#allocation3_spill] sm:$0xff]  ;;  %v2993_v9 = vld [vmem:[#allocation6_spill] sm:$0xff] }
 0x23b   :  { %v1049_v45 = vmul.f32 %v2374_v35, %v982_v40  ;;  %v1112_v36 = vadd.f32 %v2391_v8, %v1045_v11  ;;  %v1172_v42 = vmax.f32 %v1108_v62, 0.0  ;;  %1232 = vst.msk [vmem:[%s2893_s4 + $0xb8] sm:$0xff] %vm532_vm3, %v1168_v0  ;;  %v987_v12 = vmul.f32 %v2363_v49, %v2192_v7 }
 0x23c   :  { %v1050_v1 = vmul.f32 %v2374_v35, %v983_v51  ;;  %v1113_v26 = vadd.f32 %v2391_v8, %v1046_v58  ;;  %v1173_v32 = vmax.f32 %v1109_v43, 0.0  ;;  %1233 = vst.msk [vmem:[%s2893_s4 + $0xc0] sm:$0xff] %vm532_vm3, %v1169_v4  ;;  %v988_v38 = vmul.f32 %v2363_v49, %v2991_v2  ;;  %v2995_v58 = vld [vmem:[#allocation4_spill] sm:$0xff]  ;;  %v2999_v2 = vld [vmem:[#allocation22_spill] sm:$0xff] }
 0x23d   :  { %v1051_v5 = vmul.f32 %v2374_v35, %v984_v54  ;;  %v1114_v63 = vadd.f32 %v2391_v8, %v1047_v24  ;;  %v1174_v39 = vmax.f32 %v1110_v14, 0.0  ;;  %1234 = vst.msk [vmem:[%s2893_s4 + $0xc8] sm:$0xff] %vm532_vm3, %v1170_v48  ;;  %v989_v7 = vmul.f32 %v2363_v49, %v2206_v10  ;;  %v2996_v24 = vld [vmem:[#allocation19_spill] sm:$0xff] }
 0x23e   :  { %v1052_v21 = vmul.f32 %v2374_v35, %v985_v57  ;;  %v1115_v19 = vadd.f32 %v2391_v8, %v1048_v27  ;;  %v1175_v3 = vmax.f32 %v1111_v34, 0.0  ;;  %1235 = vst.msk [vmem:[%s2893_s4 + $0xd0] sm:$0xff] %vm532_vm3, %v1171_v29  ;;  %v990_v28 = vmul.f32 %v2363_v49, %v2213_v13  ;;  %v2997_v34 = vld [vmem:[#allocation20_spill] sm:$0xff] }
 0x23f   :  { %v1053_v15 = vmul.f32 %v2374_v35, %v986_v60  ;;  %v1116_v33 = vadd.f32 %v2391_v8, %v1049_v45  ;;  %v1176_v20 = vmax.f32 %v1112_v36, 0.0  ;;  %1236 = vst.msk [vmem:[%s2893_s4 + $0xd8] sm:$0xff] %vm532_vm3, %v1172_v42  ;;  %v991_v10 = vmul.f32 %v2363_v49, %v2220_v6  ;;  %v2992_v6 = vld [vmem:[#allocation5_spill] sm:$0xff] }
 0x240   :  { %v1054_v50 = vmul.f32 %v2374_v35, %v987_v12  ;;  %v1117_v61 = vadd.f32 %v2391_v8, %v1050_v1  ;;  %v1177_v37 = vmax.f32 %v1113_v26, 0.0  ;;  %1237 = vst.msk [vmem:[%s2893_s4 + $0xe0] sm:$0xff] %vm532_vm3, %v1173_v32  ;;  %v992_v13 = vmul.f32 %v2363_v49, %v2227_v30  ;;  %v2998_v42 = vld [vmem:[#allocation21_spill] sm:$0xff] }
 0x241   :  { %v1055_v16 = vmul.f32 %v2374_v35, %v988_v38  ;;  %v1118_v53 = vadd.f32 %v2391_v8, %v1051_v5  ;;  %v1178_v31 = vmax.f32 %v1114_v63, 0.0  ;;  %1238 = vst.msk [vmem:[%s2893_s4 + $0xe8] sm:$0xff] %vm532_vm3, %v1174_v39  ;;  %v993_v56 = vmul.f32 %v2363_v49, %v2992_v6 }
 0x242   :  { %v1056_v41 = vmul.f32 %v2374_v35, %v989_v7  ;;  %v1119_v59 = vadd.f32 %v2391_v8, %v1052_v21  ;;  %v1179_v18 = vmax.f32 %v1115_v19, 0.0  ;;  %1239 = vst.msk [vmem:[%s2893_s4 + $0xf0] sm:$0xff] %vm532_vm3, %v1175_v3  ;;  %v994_v30 = vmul.f32 %v2363_v49, %v2241_v55  ;;  %v2994_v55 = vld [vmem:[#allocation12_spill] sm:$0xff]  ;;  %v3000_v7 = vld [vmem:[#allocation9_spill] sm:$0xff] }
 0x243   :  { %v1057_v22 = vmul.f32 %v2374_v35, %v990_v28  ;;  %v1120_v44 = vadd.f32 %v2391_v8, %v1053_v15  ;;  %v1180_v23 = vmax.f32 %v1116_v33, 0.0  ;;  %1240 = vst.msk [vmem:[%s2893_s4 + $0xf8] sm:$0xff] %vm532_vm3, %v1176_v20  ;;  %v995_v25 = vmul.f32 %v2363_v49, %v2993_v9  ;;  %v3001_v15 = vld [vmem:[#allocation11_spill] sm:$0xff]  ;;  %v3005_v9 = vld [vmem:[#allocation16_spill] sm:$0xff] }
 0x244   :  { %v1058_v46 = vmul.f32 %v2374_v35, %v991_v10  ;;  %v1121_v40 = vadd.f32 %v2391_v8, %v1054_v50  ;;  %v1181_v11 = vmax.f32 %v1117_v61, 0.0  ;;  %1241 = vst.msk [vmem:[%s2893_s4 + $0x100] sm:$0xff] %vm532_vm3, %v1177_v37  ;;  %v996_v62 = vmul.f32 %v2363_v49, %v2994_v55  ;;  %v3002_v61 = vld [vmem:[#allocation13_spill] sm:$0xff] }
 0x245   :  { %v1059_v0 = vmul.f32 %v2374_v35, %v992_v13  ;;  %v1122_v47 = vadd.f32 %v2391_v8, %v1055_v16  ;;  %v1182_v51 = vmax.f32 %v1118_v53, 0.0  ;;  %1242 = vst.msk [vmem:[%s2893_s4 + $0x108] sm:$0xff] %vm532_vm3, %v1178_v31  ;;  %v997_v43 = vmul.f32 %v2363_v49, %v2995_v58  ;;  %v3003_v31 = vld [vmem:[#allocation14_spill] sm:$0xff]  ;;  %v3006_v55 = vld [vmem:[#allocation17_spill] sm:$0xff] }
 0x246   :  { %v1060_v4 = vmul.f32 %v2374_v35, %v993_v56  ;;  %v1123_v52 = vadd.f32 %v2391_v8, %v1056_v41  ;;  %v1183_v54 = vmax.f32 %v1119_v59, 0.0  ;;  %1243 = vst.msk [vmem:[%s2893_s4 + $0x110] sm:$0xff] %vm532_vm3, %v1179_v18  ;;  %v998_v14 = vmul.f32 %v2363_v49, %v2996_v24  ;;  %v3004_v18 = vld [vmem:[#allocation15_spill] sm:$0xff]  ;;  %v3007_v58 = vld [vmem:[#allocation18_spill] sm:$0xff] }
 0x247   :  { %v1061_v48 = vmul.f32 %v2374_v35, %v994_v30  ;;  %v1124_v57 = vadd.f32 %v2391_v8, %v1057_v22  ;;  %v1184_v27 = vmax.f32 %v1120_v44, 0.0  ;;  %1244 = vst.msk [vmem:[%s2893_s4 + $0x118] sm:$0xff] %vm532_vm3, %v1180_v23  ;;  %v999_v29 = vmul.f32 %v2363_v49, %v2997_v34 }
 0x248   :  { %v1062_v60 = vmul.f32 %v2374_v35, %v995_v25  ;;  %v1125_v45 = vadd.f32 %v2391_v8, %v1058_v46  ;;  %v1185_v36 = vmax.f32 %v1121_v40, 0.0  ;;  %1245 = vst.msk [vmem:[%s2893_s4 + $0x120] sm:$0xff] %vm532_vm3, %v1181_v11  ;;  %v1000_v12 = vmul.f32 %v2363_v49, %v2998_v42 }
 0x249   :  { %v1063_v1 = vmul.f32 %v2374_v35, %v996_v62  ;;  %v1126_v26 = vadd.f32 %v2391_v8, %v1059_v0  ;;  %v1186_v32 = vmax.f32 %v1122_v47, 0.0  ;;  %1246 = vst.msk [vmem:[%s2893_s4 + $0x128] sm:$0xff] %vm532_vm3, %v1182_v51  ;;  %v1001_v38 = vmul.f32 %v2363_v49, %v2999_v2 }
 0x24a   :  { %v1064_v5 = vmul.f32 %v2374_v35, %v997_v43  ;;  %v1127_v63 = vadd.f32 %v2391_v8, %v1060_v4  ;;  %v1187_v39 = vmax.f32 %v1123_v52, 0.0  ;;  %1247 = vst.msk [vmem:[%s2893_s4 + $0x130] sm:$0xff] %vm532_vm3, %v1183_v54  ;;  %v1002_v21 = vmul.f32 %v2363_v49, %v3000_v7 }
 0x24b   :  { %v1065_v19 = vmul.f32 %v2374_v35, %v998_v14  ;;  %v1128_v3 = vadd.f32 %v2391_v8, %v1061_v48  ;;  %v1188_v28 = vmax.f32 %v1124_v57, 0.0  ;;  %1248 = vst.msk [vmem:[%s2893_s4 + $0x138] sm:$0xff] %vm532_vm3, %v1184_v27  ;;  %v1003_v33 = vmul.f32 %v2363_v49, %v3001_v15 }
 0x24c   :  { %v1066_v20 = vmul.f32 %v2374_v35, %v999_v29  ;;  %v1129_v10 = vadd.f32 %v2391_v8, %v1062_v60  ;;  %v1189_v50 = vmax.f32 %v1125_v45, 0.0  ;;  %1249 = vst.msk [vmem:[%s2893_s4 + $0x140] sm:$0xff] %vm532_vm3, %v1185_v36  ;;  %v1004_v37 = vmul.f32 %v2363_v49, %v3002_v61 }
 0x24d   :  { %v1067_v13 = vmul.f32 %v2374_v35, %v1000_v12  ;;  %v1130_v16 = vadd.f32 %v2391_v8, %v1063_v1  ;;  %v1190_v53 = vmax.f32 %v1126_v26, 0.0  ;;  %1250 = vst.msk [vmem:[%s2893_s4 + $0x148] sm:$0xff] %vm532_vm3, %v1186_v32  ;;  %v1005_v6 = vmul.f32 %v2363_v49, %v3003_v31 }
 0x24e   :  { %v1068_v56 = vmul.f32 %v2374_v35, %v1001_v38  ;;  %v1131_v41 = vadd.f32 %v2391_v8, %v1064_v5  ;;  %v1191_v59 = vmax.f32 %v1127_v63, 0.0  ;;  %1251 = vst.msk [vmem:[%s2893_s4 + $0x150] sm:$0xff] %vm532_vm3, %v1187_v39  ;;  %v1006_v30 = vmul.f32 %v2363_v49, %v3004_v18 }
 0x24f   :  { %v1069_v22 = vmul.f32 %v2374_v35, %v1002_v21  ;;  %v1132_v44 = vadd.f32 %v2391_v8, %v1065_v19  ;;  %v1192_v23 = vmax.f32 %v1128_v3, 0.0  ;;  %1252 = vst.msk [vmem:[%s2893_s4 + $0x158] sm:$0xff] %vm532_vm3, %v1188_v28  ;;  %v1007_v25 = vmul.f32 %v2363_v49, %v3005_v9 }
 0x250   :  { %v1070_v46 = vmul.f32 %v2374_v35, %v1003_v33  ;;  %v1133_v40 = vadd.f32 %v2391_v8, %v1066_v20  ;;  %v1193_v11 = vmax.f32 %v1129_v10, 0.0  ;;  %1253 = vst.msk [vmem:[%s2893_s4 + $0x160] sm:$0xff] %vm532_vm3, %v1189_v50  ;;  %v1008_v62 = vmul.f32 %v2363_v49, %v3006_v55 }
 0x251   :  { %v1071_v0 = vmul.f32 %v2374_v35, %v1004_v37  ;;  %v1134_v47 = vadd.f32 %v2391_v8, %v1067_v13  ;;  %v1194_v51 = vmax.f32 %v1130_v16, 0.0  ;;  %1254 = vst.msk [vmem:[%s2893_s4 + $0x168] sm:$0xff] %vm532_vm3, %v1190_v53  ;;  %v1009_v43 = vmul.f32 %v2363_v49, %v3007_v58 }
 0x252   :  { %v1072_v4 = vmul.f32 %v2374_v35, %v1005_v6  ;;  %v1135_v52 = vadd.f32 %v2391_v8, %v1068_v56  ;;  %v1195_v54 = vmax.f32 %v1131_v41, 0.0  ;;  %1255 = vst.msk [vmem:[%s2893_s4 + $0x170] sm:$0xff] %vm532_vm3, %v1191_v59  ;;  %v1073_v24 = vmul.f32 %v2374_v35, %v1006_v30 }
 0x253   :  { %v1136_v14 = vadd.f32 %v2391_v8, %v1069_v22  ;;  %v1196_v48 = vmax.f32 %v1132_v44, 0.0  ;;  %1256 = vst.msk [vmem:[%s2893_s4 + $0x178] sm:$0xff] %vm532_vm3, %v1192_v23  ;;  %v1074_v49 = vmul.f32 %v2374_v35, %v1007_v25  ;;  %v1137_v57 = vadd.f32 %v2391_v8, %v1070_v46 }
 0x254   :  { %v1197_v27 = vmax.f32 %v1133_v40, 0.0  ;;  %1257 = vst.msk [vmem:[%s2893_s4 + $0x180] sm:$0xff] %vm532_vm3, %v1193_v11  ;;  %v1075_v34 = vmul.f32 %v2374_v35, %v1008_v62  ;;  %v1138_v29 = vadd.f32 %v2391_v8, %v1071_v0  ;;  %v1198_v60 = vmax.f32 %v1134_v47, 0.0 }
 0x255   :  { %1258 = vst.msk [vmem:[%s2893_s4 + $0x188] sm:$0xff] %vm532_vm3, %v1194_v51  ;;  %v1076_v45 = vmul.f32 %v2374_v35, %v1009_v43  ;;  %v1139_v36 = vadd.f32 %v2391_v8, %v1072_v4  ;;  %v1199_v42 = vmax.f32 %v1135_v52, 0.0  ;;  %v1140_v12 = vadd.f32 %v2391_v8, %v1073_v24 }
 0x256   :  { %1259 = vst.msk [vmem:[%s2893_s4 + $0x190] sm:$0xff] %vm532_vm3, %v1195_v54  ;;  %v1200_v1 = vmax.f32 %v1136_v14, 0.0  ;;  %v1141_v26 = vadd.f32 %v2391_v8, %v1074_v49  ;;  %v1201_v32 = vmax.f32 %v1137_v57, 0.0  ;;  %v1142_v35 = vadd.f32 %v2391_v8, %v1075_v34 }
 0x257   :  { %1260 = vst.msk [vmem:[%s2893_s4 + $0x198] sm:$0xff] %vm532_vm3, %v1196_v48  ;;  %v1202_v2 = vmax.f32 %v1138_v29, 0.0  ;;  %v1143_v38 = vadd.f32 %v2391_v8, %v1076_v45  ;;  %v1203_v5 = vmax.f32 %v1139_v36, 0.0  ;;  %v1204_v63 = vmax.f32 %v1140_v12, 0.0 }
 0x258   :  { %1261 = vst.msk [vmem:[%s2893_s4 + $0x1a0] sm:$0xff] %vm532_vm3, %v1197_v27  ;;  %v1205_v39 = vmax.f32 %v1141_v26, 0.0  ;;  %v1206_v7 = vmax.f32 %v1142_v35, 0.0  ;;  %v1208_v21 = vmax.f32 %v2425_v17, 0.0 }
 0x259   :  { %1262 = vst.msk [vmem:[%s2893_s4 + $0x1a8] sm:$0xff] %vm532_vm3, %v1198_v60  ;;  %v1207_v8 = vmax.f32 %v1143_v38, 0.0 }
 0x25a   :  { %1263 = vst.msk [vmem:[%s2893_s4 + $0x1b0] sm:$0xff] %vm532_vm3, %v1199_v42 }
 0x25b   :  { %1264 = vst.msk [vmem:[%s2893_s4 + $0x1b8] sm:$0xff] %vm532_vm3, %v1200_v1 }
 0x25c   :  { %1265 = vst.msk [vmem:[%s2893_s4 + $0x1c0] sm:$0xff] %vm532_vm3, %v1201_v32 }
 0x25d   :  { %1266 = vst.msk [vmem:[%s2893_s4 + $0x1c8] sm:$0xff] %vm532_vm3, %v1202_v2 }
 0x25e   :  { %1267 = vst.msk [vmem:[%s2893_s4 + $0x1d0] sm:$0xff] %vm532_vm3, %v1203_v5 }
 0x25f   :  { %1268 = vst.msk [vmem:[%s2893_s4 + $0x1d8] sm:$0xff] %vm532_vm3, %v1204_v63 }
 0x260   :  { %1269 = vst.msk [vmem:[%s2893_s4 + $0x1e0] sm:$0xff] %vm532_vm3, %v1205_v39 }
 0x261   :  { %1270 = vst.msk [vmem:[%s2893_s4 + $0x1e8] sm:$0xff] %vm532_vm3, %v1206_v7 }
 0x262   :  { %1271 = vst.msk [vmem:[%s2893_s4 + $0x1f0] sm:$0xff] %vm532_vm3, %v1207_v8 }
 0x263   :  { %1272 = vst.msk [vmem:[%s2893_s4 + $0x1f8] sm:$0xff] %vm532_vm3, %v1208_v21 }

</bundles_post_ra>
